<compile_context>
chip_gen: v7x
topology: tpu7x:2x2x1
jax: 0.10.0
libtpu: 0.0.40
codegen_flags: <defaults>
</compile_context>

<pallas_src>
import functools

import jax
import jax.numpy as jnp
from jax import lax
from jax.experimental import pallas as pl
from jax.experimental.pallas import tpu as pltpu

EPS = 1e-5
# Scoped-VMEM budget: above the 16/32 MiB defaults, below v7x's 64 MiB physical.
_VMEM_LIMIT = 48 * 1024 * 1024
# Per-strip bf16 im2col patches budget (the 9x-activation slab).
_DEFAULT_STRIP_BUDGET = 4 * 1024 * 1024


# --------------------------------------------------------------------------
# in-kernel helpers
# --------------------------------------------------------------------------
def _stats(h):
    """Per-channel (sum, sum-of-squares) of an (M, C) f32 slab -> (2, C)."""
    s = jnp.sum(h, axis=0, keepdims=True)
    ss = jnp.sum(h * h, axis=0, keepdims=True)
    return jnp.concatenate([s, ss], axis=0)


def _conv3x3_strips(a_hwc, w_ref, out_ref, stats_ref, *, strip_rows,
                    channel_major_out):
    """3x3 SAME conv of one (Hp, Wp, cin) bf16 image as im2col MXU matmuls,
    tiled over output-row strips so the (rows*Wp, 9*cin) bf16 patches slab
    stays within a fixed VMEM budget.

    Writes bf16 results into out_ref[0] ((M, cout), or channel-major
    (cout, M) if channel_major_out) and per-channel f32 sum / sum-of-squares
    into stats_ref[0] ((2, cout))."""
    Hp, Wp, cin = a_hwc.shape
    cout = w_ref.shape[-1]

    # zero-pad the halo in bf16 (half the VMEM / relayout work of f32)
    zr = jnp.zeros((1, Wp, cin), jnp.bfloat16)
    p = jnp.concatenate([zr, a_hwc, zr], axis=0)              # (Hp+2, Wp,   cin)
    zc = jnp.zeros((Hp + 2, 1, cin), jnp.bfloat16)
    p = jnp.concatenate([zc, p, zc], axis=1)                  # (Hp+2, Wp+2, cin)

    w = w_ref[...]                                            # (9*cin, cout) bf16
    stats = jnp.zeros((2, cout), jnp.float32)
    for r0 in range(0, Hp, strip_rows):                       # static unroll
        rows = min(strip_rows, Hp - r0)
        taps = [p[r0 + ky:r0 + ky + rows, kx:kx + Wp, :]
                for ky in range(3) for kx in range(3)]
        patches = jnp.concatenate(taps, axis=-1)              # (rows, Wp, 9*cin)
        patches = patches.reshape(rows * Wp, 9 * cin)         # Wp % 8 keeps this cheap
        h = jnp.dot(patches, w,
                    preferred_element_type=jnp.float32)       # (rows*Wp, cout) f32
        stats = stats + _stats(h)                             # single-pass BN stats
        hb = h.astype(out_ref.dtype)
        if channel_major_out:
            out_ref[0, :, r0 * Wp:(r0 + rows) * Wp] = hb.T    # bf16 transpose
        else:
            out_ref[0, r0 * Wp:(r0 + rows) * Wp, :] = hb
    stats_ref[0] = stats


# --------------------------------------------------------------------------
# kernels
# --------------------------------------------------------------------------
def _pool_conv1_kernel(x_ref, w1_ref, h1_ref, s1_ref, *, strip_rows):
    # x_ref : (1, H, W, Cin) bf16      w1_ref: (9*Cin, Cmid) bf16
    # h1_ref: (1, Hp*Wp, Cmid) bf16    s1_ref: (1, 2, Cmid) f32
    _, H, W, Cin = x_ref.shape
    Hp, Wp = H // 2, W // 2
    x = x_ref[0]                                              # (H, W, Cin) bf16
    # MaxPool2d(2): pool H via a leading-dim split, then W via a sublane split.
    x4 = x.reshape(Hp, 2, W, Cin)
    x = jnp.maximum(x4[:, 0], x4[:, 1])                       # (Hp, W, Cin)
    x5 = x.reshape(Hp, Wp, 2, Cin)
    pooled = jnp.maximum(x5[:, :, 0, :], x5[:, :, 1, :])      # (Hp, Wp, Cin)
    _conv3x3_strips(pooled, w1_ref, h1_ref, s1_ref,
                    strip_rows=strip_rows, channel_major_out=False)


def _bn1_conv2_kernel(h1_ref, sc1_ref, sh1_ref, w2_ref, h2_ref, s2_ref, *,
                      Hp, Wp, strip_rows):
    # h1_ref: (1, M, Cmid) bf16; sc1/sh1: (1, Cmid) f32; w2_ref: (9*Cmid, Cout) bf16
    # h2_ref: (1, Cout, M) bf16 (channel-major, M lane-dense); s2_ref: (1, 2, Cout) f32
    _, M, Cmid = h1_ref.shape
    a = h1_ref[0].astype(jnp.float32) * sc1_ref[...] + sh1_ref[...]
    a = jnp.maximum(a, 0.0)                                   # BN1 + ReLU, (M, Cmid) f32
    a = a.astype(jnp.bfloat16).reshape(Hp, Wp, Cmid)          # bf16 before im2col
    _conv3x3_strips(a, w2_ref, h2_ref, s2_ref,
                    strip_rows=strip_rows, channel_major_out=True)


def _bn2_kernel(h2_ref, sc2_ref, sh2_ref, o_ref):
    # h2_ref: (1, Cout, TM) bf16; sc2/sh2: (Cout, 1) f32 -> o_ref: (1, Cout, TM) f32
    y = h2_ref[0].astype(jnp.float32) * sc2_ref[...] + sh2_ref[...]
    o_ref[0] = jnp.maximum(y, 0.0).astype(o_ref.dtype)        # BN2 + ReLU, no transpose


# --------------------------------------------------------------------------
# wrapper helpers
# --------------------------------------------------------------------------
def _bn_scale_shift(stats, g, b, m_total):
    """stats: (N, 2, C) per-image partial sums -> fused BN scale/shift (C,)."""
    s = jnp.sum(stats, axis=0)                                # (2, C)
    mean = s[0] / m_total
    var = jnp.maximum(s[1] / m_total - mean * mean, 0.0)      # clamp: no NaN in rsqrt
    scale = g * lax.rsqrt(var + EPS)
    shift = b - mean * scale
    return scale.astype(jnp.float32), shift.astype(jnp.float32)


def _pick_strip_rows(Hp, Wp, k9, budget_bytes):
    """Output-row strip size so the bf16 (rows*Wp, k9) patches slab fits budget."""
    rows = max(1, budget_bytes // (Wp * k9 * 2))
    return int(min(rows, Hp))


def _pick_m_tile(M):
    """Lane-dense M tile for K3 (multiple of 128 dividing M, or the full M)."""
    for t in (2048, 1024, 512, 256, 128):
        if M > t and M % t == 0:
            return t
    return M


# --------------------------------------------------------------------------
# wrappers
# --------------------------------------------------------------------------
def downscale_block_nhwc(x, w1, g1, b1, w2, g2, b2, *,
                         strip_budget_bytes=_DEFAULT_STRIP_BUDGET):
    """x: (N, H, W, Cin) -> (N, Cout, Hp*Wp) f32 (channel-major output)."""
    N, H, W, Cin = x.shape
    assert H % 2 == 0 and W % 2 == 0, "MaxPool2d(2) path assumes even H and W"
    Hp, Wp = H // 2, W // 2
    M = Hp * Wp
    Cmid = w1.shape[-1]
    Cout = w2.shape[-1]

    x = x.astype(jnp.bfloat16)                                # bf16 activation path
    # HWIO -> (9*Cin, Cout) rows ordered (ky, kx, cin); bf16 for the MXU.
    w1f = w1.reshape(9 * Cin, Cmid).astype(jnp.bfloat16)
    w2f = w2.reshape(9 * Cmid, Cout).astype(jnp.bfloat16)

    tr1 = _pick_strip_rows(Hp, Wp, 9 * Cin, strip_budget_bytes)
    tr2 = _pick_strip_rows(Hp, Wp, 9 * Cmid, strip_budget_bytes)
    tm3 = _pick_m_tile(M)

    par1 = pltpu.CompilerParams(dimension_semantics=("parallel",),
                                vmem_limit_bytes=_VMEM_LIMIT)
    par2 = pltpu.CompilerParams(dimension_semantics=("parallel", "parallel"),
                                vmem_limit_bytes=_VMEM_LIMIT)

    ce1 = pl.CostEstimate(
        flops=2 * N * M * 9 * Cin * Cmid + N * H * W * Cin,
        transcendentals=0,
        bytes_accessed=N * H * W * Cin * 2 + 9 * Cin * Cmid * 2
        + N * M * Cmid * 2 + N * 2 * Cmid * 4)
    ce2 = pl.CostEstimate(
        flops=2 * N * M * 9 * Cmid * Cout + 2 * N * M * Cmid,
        transcendentals=0,
        bytes_accessed=N * M * Cmid * 2 + 9 * Cmid * Cout * 2
        + N * M * Cout * 2 + N * 2 * Cout * 4 + 4 * Cmid * 4)
    ce3 = pl.CostEstimate(
        flops=2 * N * M * Cout,
        transcendentals=0,
        bytes_accessed=N * Cout * M * 2 + N * Cout * M * 4 + 4 * Cout * 4)

    # ---- kernel 1: maxpool + conv1 (+ BN1 statistics) ---------------------
    h1_raw, st1 = pl.pallas_call(
        functools.partial(_pool_conv1_kernel, strip_rows=tr1),
        out_shape=(jax.ShapeDtypeStruct((N, M, Cmid), jnp.bfloat16),
                   jax.ShapeDtypeStruct((N, 2, Cmid), jnp.float32)),
        grid=(N,),
        in_specs=[pl.BlockSpec((1, H, W, Cin), lambda n: (n, 0, 0, 0)),
                  pl.BlockSpec((9 * Cin, Cmid), lambda n: (0, 0))],
        out_specs=(pl.BlockSpec((1, M, Cmid), lambda n: (n, 0, 0)),
                   pl.BlockSpec((1, 2, Cmid), lambda n: (n, 0, 0))),
        compiler_params=par1,
        cost_estimate=ce1,
    )(x, w1f)
    sc1, sh1 = _bn_scale_shift(st1, g1, b1, N * M)
    sc1 = sc1.reshape(1, Cmid)
    sh1 = sh1.reshape(1, Cmid)

    # ---- kernel 2: BN1 + ReLU + conv2 (+ BN2 statistics) ------------------
    h2_raw, st2 = pl.pallas_call(
        functools.partial(_bn1_conv2_kernel, Hp=Hp, Wp=Wp, strip_rows=tr2),
        out_shape=(jax.ShapeDtypeStruct((N, Cout, M), jnp.bfloat16),
                   jax.ShapeDtypeStruct((N, 2, Cout), jnp.float32)),
        grid=(N,),
        in_specs=[pl.BlockSpec((1, M, Cmid), lambda n: (n, 0, 0)),
                  pl.BlockSpec((1, Cmid), lambda n: (0, 0)),
                  pl.BlockSpec((1, Cmid), lambda n: (0, 0)),
                  pl.BlockSpec((9 * Cmid, Cout), lambda n: (0, 0))],
        out_specs=(pl.BlockSpec((1, Cout, M), lambda n: (n, 0, 0)),
                   pl.BlockSpec((1, 2, Cout), lambda n: (n, 0, 0))),
        compiler_params=par1,
        cost_estimate=ce2,
    )(h1_raw, sc1, sh1, w2f)
    sc2, sh2 = _bn_scale_shift(st2, g2, b2, N * M)
    sc2 = sc2.reshape(Cout, 1)
    sh2 = sh2.reshape(Cout, 1)

    # ---- kernel 3: BN2 + ReLU (lane-dense, transpose-free, M-tiled) -------
    y = pl.pallas_call(
        _bn2_kernel,
        out_shape=jax.ShapeDtypeStruct((N, Cout, M), jnp.float32),
        grid=(N, M // tm3),
        in_specs=[pl.BlockSpec((1, Cout, tm3), lambda n, m: (n, 0, m)),
                  pl.BlockSpec((Cout, 1), lambda n, m: (0, 0)),
                  pl.BlockSpec((Cout, 1), lambda n, m: (0, 0))],
        out_specs=pl.BlockSpec((1, Cout, tm3), lambda n, m: (n, 0, m)),
        compiler_params=par2,
        cost_estimate=ce3,
    )(h2_raw, sc2, sh2)
    return y


def downscale_block_nchw(x_nchw, params, *,
                         strip_budget_bytes=_DEFAULT_STRIP_BUDGET):
    """PyTorch-facing wrapper: NCHW in, NCHW out."""
    w1, g1, b1, w2, g2, b2 = params
    N, _, H, W = x_nchw.shape
    Cout = w2.shape[-1]
    # NCHW -> NHWC fused with the bf16 cast: halves the biggest HBM read.
    x = jnp.transpose(x_nchw, (0, 2, 3, 1)).astype(jnp.bfloat16)
    y = downscale_block_nhwc(x, w1, g1, b1, w2, g2, b2,
                             strip_budget_bytes=strip_budget_bytes)
    return y.reshape(N, Cout, H // 2, W // 2)                 # already channel-major


# --------------------------------------------------------------------------
# pure-JAX reference (f32) for validation
# --------------------------------------------------------------------------
def _reference_nhwc(x, w1, g1, b1, w2, g2, b2):
    p = lax.reduce_window(x, -jnp.inf, lax.max,
                          (1, 2, 2, 1), (1, 2, 2, 1), "VALID")

    def conv_bn_relu(h, w, g, beta):
        y = lax.conv_general_dilated(
            h, w, (1, 1), "SAME",
            dimension_numbers=("NHWC", "HWIO", "NHWC"),
            precision=lax.Precision.HIGHEST)
        mean = y.mean(axis=(0, 1, 2), keepdims=True)
        var = jnp.square(y - mean).mean(axis=(0, 1, 2), keepdims=True)
        y = (y - mean) / jnp.sqrt(var + EPS) * g.reshape(1, 1, 1, -1) \
            + beta.reshape(1, 1, 1, -1)
        return jnp.maximum(y, 0.0)

    h = conv_bn_relu(p, w1, g1, b1)
    return conv_bn_relu(h, w2, g2, b2)


if __name__ == "__main__":
    N, Cin, Cout = 2, 4, 8
    Cmid = Cout  # mid_channels defaults to out_channels

    key = jax.random.PRNGKey(0)
    kx, kx2, k1, k2, kg1, kb1, kg2, kb2 = jax.random.split(key, 8)

    w1 = 0.2 * jax.random.normal(k1, (3, 3, Cin, Cmid), jnp.float32)   # HWIO, no bias
    w2 = 0.2 * jax.random.normal(k2, (3, 3, Cmid, Cout), jnp.float32)
    g1 = 1.0 + 0.1 * jax.random.normal(kg1, (Cmid,), jnp.float32)
    b1 = 0.1 * jax.random.normal(kb1, (Cmid,), jnp.float32)
    g2 = 1.0 + 0.1 * jax.random.normal(kg2, (Cout,), jnp.float32)
    b2 = 0.1 * jax.random.normal(kb2, (Cout,), jnp.float32)
    params = (w1, g1, b1, w2, g2, b2)

    def check(y, x_nchw):
        # bf16 activations / MXU operands with f32 accumulation -> loose tol
        x_nhwc = jnp.transpose(x_nchw, (0, 2, 3, 1))
        y_ref = jnp.transpose(_reference_nhwc(x_nhwc, *params), (0, 3, 1, 2))
        err = float(jnp.max(jnp.abs(y - y_ref)))
        assert jnp.allclose(y, y_ref, atol=3e-2, rtol=3e-2), err

    # config A: 16x16 input -> single-strip conv path, untiled K3 grid
    x_a = jax.random.normal(kx, (N, Cin, 16, 16), jnp.float32)
    y_a = jax.block_until_ready(jax.jit(downscale_block_nchw)(x_a, params))
    assert y_a.shape == (N, Cout, 8, 8)
    check(y_a, x_a)

    # config B: 32x32 input with a tiny strip budget -> exercises the
    # multi-strip (ragged) conv path and the M-tiled K3 grid
    x_b = jax.random.normal(kx2, (N, Cin, 32, 32), jnp.float32)
    fwd_b = jax.jit(functools.partial(downscale_block_nchw,
                                      strip_budget_bytes=8192))
    y_b = jax.block_until_ready(fwd_b(x_b, params))
    assert y_b.shape == (N, Cout, 16, 16)
    check(y_b, x_b)

    print("KERNEL_OK")
</pallas_src>

<mosaic_0001>
module attributes {stable_mosaic.version = 11 : i64} {
  func.func @_pool_conv1_kernel(%arg0: i32, %arg1: memref<1x16x16x4xbf16, #tpu.memory_space<vmem>>, %arg2: memref<36x8xbf16, #tpu.memory_space<vmem>>, %arg3: memref<1x64x8xbf16, #tpu.memory_space<vmem>>, %arg4: memref<1x2x8xf32, #tpu.memory_space<vmem>>) attributes {dimension_semantics = [#tpu.dimension_semantics<parallel>], iteration_bounds = array<i64: 2>, scalar_prefetch = 0 : i64, scratch_operands = 0 : i64, tpu.core_type = #tpu.core_type<tc>, window_params = [{transform_indices = @transform_0, window_bounds = array<i64: 1, 16, 16, 4>}, {pipeline_mode = #tpu.pipeline_mode<synchronous>, transform_indices = @transform_1, window_bounds = array<i64: 36, 8>}, {transform_indices = @transform_2, window_bounds = array<i64: 1, 64, 8>}, {transform_indices = @transform_3, window_bounds = array<i64: 1, 2, 8>}]} {
    %c0 = arith.constant 0 : index
    %c0_0 = arith.constant 0 : index
    %c0_1 = arith.constant 0 : index
    %c0_2 = arith.constant 0 : index
    %0 = vector.load %arg1[%c0, %c0_0, %c0_1, %c0_2] : memref<1x16x16x4xbf16, #tpu.memory_space<vmem>>, vector<1x16x16x4xbf16>
    %1 = vector.shape_cast %0 : vector<1x16x16x4xbf16> to vector<16x16x4xbf16>
    %2 = vector.shape_cast %1 : vector<16x16x4xbf16> to vector<8x2x16x4xbf16>
    %3 = vector.extract_strided_slice %2 {offsets = [0, 0, 0, 0], sizes = [8, 1, 16, 4], strides = [1, 1, 1, 1]} : vector<8x2x16x4xbf16> to vector<8x1x16x4xbf16>
    %4 = vector.shape_cast %3 : vector<8x1x16x4xbf16> to vector<8x16x4xbf16>
    %5 = vector.extract_strided_slice %2 {offsets = [0, 1, 0, 0], sizes = [8, 1, 16, 4], strides = [1, 1, 1, 1]} : vector<8x2x16x4xbf16> to vector<8x1x16x4xbf16>
    %6 = vector.shape_cast %5 : vector<8x1x16x4xbf16> to vector<8x16x4xbf16>
    %7 = arith.maximumf %4, %6 : vector<8x16x4xbf16>
    %8 = vector.shape_cast %7 : vector<8x16x4xbf16> to vector<8x8x2x4xbf16>
    %9 = vector.extract_strided_slice %8 {offsets = [0, 0, 0, 0], sizes = [8, 8, 1, 4], strides = [1, 1, 1, 1]} : vector<8x8x2x4xbf16> to vector<8x8x1x4xbf16>
    %10 = vector.shape_cast %9 : vector<8x8x1x4xbf16> to vector<8x8x4xbf16>
    %11 = vector.extract_strided_slice %8 {offsets = [0, 0, 1, 0], sizes = [8, 8, 1, 4], strides = [1, 1, 1, 1]} : vector<8x8x2x4xbf16> to vector<8x8x1x4xbf16>
    %12 = vector.shape_cast %11 : vector<8x8x1x4xbf16> to vector<8x8x4xbf16>
    %13 = arith.maximumf %10, %12 : vector<8x8x4xbf16>
    %cst = arith.constant 0.000000e+00 : bf16
    %14 = vector.broadcast %cst : bf16 to vector<1x8x4xbf16>
    %15 = tpu.concatenate %14, %13, %14 in 0 : vector<1x8x4xbf16>, vector<8x8x4xbf16>, vector<1x8x4xbf16> -> vector<10x8x4xbf16>
    %cst_3 = arith.constant 0.000000e+00 : bf16
    %16 = vector.broadcast %cst_3 : bf16 to vector<10x1x4xbf16>
    %17 = tpu.concatenate %16, %15, %16 in 1 : vector<10x1x4xbf16>, vector<10x8x4xbf16>, vector<10x1x4xbf16> -> vector<10x10x4xbf16>
    %c0_4 = arith.constant 0 : index
    %c0_5 = arith.constant 0 : index
    %18 = vector.load %arg2[%c0_4, %c0_5] : memref<36x8xbf16, #tpu.memory_space<vmem>>, vector<36x8xbf16>
    %cst_6 = arith.constant 0.000000e+00 : f32
    %19 = vector.broadcast %cst_6 : f32 to vector<2x8xf32>
    %20 = vector.extract_strided_slice %17 {offsets = [0, 0, 0], sizes = [8, 8, 4], strides = [1, 1, 1]} : vector<10x10x4xbf16> to vector<8x8x4xbf16>
    %21 = vector.extract_strided_slice %17 {offsets = [0, 1, 0], sizes = [8, 8, 4], strides = [1, 1, 1]} : vector<10x10x4xbf16> to vector<8x8x4xbf16>
    %22 = vector.extract_strided_slice %17 {offsets = [0, 2, 0], sizes = [8, 8, 4], strides = [1, 1, 1]} : vector<10x10x4xbf16> to vector<8x8x4xbf16>
    %23 = vector.extract_strided_slice %17 {offsets = [1, 0, 0], sizes = [8, 8, 4], strides = [1, 1, 1]} : vector<10x10x4xbf16> to vector<8x8x4xbf16>
    %24 = vector.extract_strided_slice %17 {offsets = [1, 1, 0], sizes = [8, 8, 4], strides = [1, 1, 1]} : vector<10x10x4xbf16> to vector<8x8x4xbf16>
    %25 = vector.extract_strided_slice %17 {offsets = [1, 2, 0], sizes = [8, 8, 4], strides = [1, 1, 1]} : vector<10x10x4xbf16> to vector<8x8x4xbf16>
    %26 = vector.extract_strided_slice %17 {offsets = [2, 0, 0], sizes = [8, 8, 4], strides = [1, 1, 1]} : vector<10x10x4xbf16> to vector<8x8x4xbf16>
    %27 = vector.extract_strided_slice %17 {offsets = [2, 1, 0], sizes = [8, 8, 4], strides = [1, 1, 1]} : vector<10x10x4xbf16> to vector<8x8x4xbf16>
    %28 = vector.extract_strided_slice %17 {offsets = [2, 2, 0], sizes = [8, 8, 4], strides = [1, 1, 1]} : vector<10x10x4xbf16> to vector<8x8x4xbf16>
    %29 = tpu.concatenate %20, %21, %22, %23, %24, %25, %26, %27, %28 in 2 : vector<8x8x4xbf16>, vector<8x8x4xbf16>, vector<8x8x4xbf16>, vector<8x8x4xbf16>, vector<8x8x4xbf16>, vector<8x8x4xbf16>, vector<8x8x4xbf16>, vector<8x8x4xbf16>, vector<8x8x4xbf16> -> vector<8x8x36xbf16>
    %30 = vector.shape_cast %29 : vector<8x8x36xbf16> to vector<64x36xbf16>
    %cst_7 = arith.constant dense<0.000000e+00> : vector<64x8xf32>
    %31 = tpu.matmul %30, %18, %cst_7 {dimension_numbers = #tpu.dot_dimension_numbers<[1], [0], [0], [1], [0, 0, 1, 1], [], []>} : vector<64x36xbf16>, vector<36x8xbf16>, vector<64x8xf32> -> vector<64x8xf32>
    %cst_8 = arith.constant dense<0.000000e+00> : vector<8xf32>
    %32 = vector.multi_reduction <add>, %31, %cst_8 [0] : vector<64x8xf32> to vector<8xf32>
    %33 = vector.shape_cast %32 : vector<8xf32> to vector<1x8xf32>
    %34 = arith.mulf %31, %31 : vector<64x8xf32>
    %cst_9 = arith.constant dense<0.000000e+00> : vector<8xf32>
    %35 = vector.multi_reduction <add>, %34, %cst_9 [0] : vector<64x8xf32> to vector<8xf32>
    %36 = vector.shape_cast %35 : vector<8xf32> to vector<1x8xf32>
    %37 = tpu.concatenate %33, %36 in 0 : vector<1x8xf32>, vector<1x8xf32> -> vector<2x8xf32>
    %38 = arith.addf %19, %37 : vector<2x8xf32>
    %39 = arith.truncf %31 : vector<64x8xf32> to vector<64x8xbf16>
    %c0_10 = arith.constant 0 : index
    %c0_11 = arith.constant 0 : index
    %c0_12 = arith.constant 0 : index
    %40 = vector.load %arg3[%c0_10, %c0_11, %c0_12] : memref<1x64x8xbf16, #tpu.memory_space<vmem>>, vector<1x64x8xbf16>
    %41 = vector.shape_cast %40 : vector<1x64x8xbf16> to vector<64x8xbf16>
    %42 = vector.shape_cast %39 : vector<64x8xbf16> to vector<1x64x8xbf16>
    tpu.vector_store %arg3[%c0_10, %c0_11, %c0_12], %42 {strides = array<i32>} : memref<1x64x8xbf16, #tpu.memory_space<vmem>>, vector<1x64x8xbf16>,
    %c0_13 = arith.constant 0 : index
    %c0_14 = arith.constant 0 : index
    %c0_15 = arith.constant 0 : index
    %43 = vector.load %arg4[%c0_13, %c0_14, %c0_15] : memref<1x2x8xf32, #tpu.memory_space<vmem>>, vector<1x2x8xf32>
    %44 = vector.shape_cast %43 : vector<1x2x8xf32> to vector<2x8xf32>
    %45 = vector.shape_cast %38 : vector<2x8xf32> to vector<1x2x8xf32>
    tpu.vector_store %arg4[%c0_13, %c0_14, %c0_15], %45 {strides = array<i32>} : memref<1x2x8xf32, #tpu.memory_space<vmem>>, vector<1x2x8xf32>,
    return
  }
  func.func @transform_0(%arg0: i32) -> (i32, i32, i32, i32) {
    %c0_i32 = arith.constant 0 : i32
    %c0_i32_0 = arith.constant 0 : i32
    %c0_i32_1 = arith.constant 0 : i32
    %c0_i32_2 = arith.constant 0 : i32
    return %arg0, %c0_i32, %c0_i32_0, %c0_i32_1 : i32, i32, i32, i32
  }
  func.func @transform_1(%arg0: i32) -> (i32, i32) {
    %c0_i32 = arith.constant 0 : i32
    %c0_i32_0 = arith.constant 0 : i32
    %c0_i32_1 = arith.constant 0 : i32
    return %c0_i32, %c0_i32_0 : i32, i32
  }
  func.func @transform_2(%arg0: i32) -> (i32, i32, i32) {
    %c0_i32 = arith.constant 0 : i32
    %c0_i32_0 = arith.constant 0 : i32
    %c0_i32_1 = arith.constant 0 : i32
    return %arg0, %c0_i32, %c0_i32_0 : i32, i32, i32
  }
  func.func @transform_3(%arg0: i32) -> (i32, i32, i32) {
    %c0_i32 = arith.constant 0 : i32
    %c0_i32_0 = arith.constant 0 : i32
    %c0_i32_1 = arith.constant 0 : i32
    return %arg0, %c0_i32, %c0_i32_0 : i32, i32, i32
  }
}

module attributes {stable_mosaic.version = 11 : i64} {
  func.func @_bn1_conv2_kernel(%arg0: i32, %arg1: memref<1x64x8xbf16, #tpu.memory_space<vmem>>, %arg2: memref<1x8xf32, #tpu.memory_space<vmem>>, %arg3: memref<1x8xf32, #tpu.memory_space<vmem>>, %arg4: memref<72x8xbf16, #tpu.memory_space<vmem>>, %arg5: memref<1x8x64xbf16, #tpu.memory_space<vmem>>, %arg6: memref<1x2x8xf32, #tpu.memory_space<vmem>>) attributes {dimension_semantics = [#tpu.dimension_semantics<parallel>], iteration_bounds = array<i64: 2>, scalar_prefetch = 0 : i64, scratch_operands = 0 : i64, tpu.core_type = #tpu.core_type<tc>, window_params = [{transform_indices = @transform_0, window_bounds = array<i64: 1, 64, 8>}, {pipeline_mode = #tpu.pipeline_mode<synchronous>, transform_indices = @transform_1, window_bounds = array<i64: 1, 8>}, {pipeline_mode = #tpu.pipeline_mode<synchronous>, transform_indices = @transform_2, window_bounds = array<i64: 1, 8>}, {pipeline_mode = #tpu.pipeline_mode<synchronous>, transform_indices = @transform_3, window_bounds = array<i64: 72, 8>}, {transform_indices = @transform_4, window_bounds = array<i64: 1, 8, 64>}, {transform_indices = @transform_5, window_bounds = array<i64: 1, 2, 8>}]} {
    %c0 = arith.constant 0 : index
    %c0_0 = arith.constant 0 : index
    %c0_1 = arith.constant 0 : index
    %0 = vector.load %arg1[%c0, %c0_0, %c0_1] : memref<1x64x8xbf16, #tpu.memory_space<vmem>>, vector<1x64x8xbf16>
    %1 = vector.shape_cast %0 : vector<1x64x8xbf16> to vector<64x8xbf16>
    %2 = arith.extf %1 : vector<64x8xbf16> to vector<64x8xf32>
    %c0_2 = arith.constant 0 : index
    %c0_3 = arith.constant 0 : index
    %3 = vector.load %arg2[%c0_2, %c0_3] : memref<1x8xf32, #tpu.memory_space<vmem>>, vector<1x8xf32>
    %4 = vector.broadcast %3 : vector<1x8xf32> to vector<64x8xf32>
    %5 = arith.mulf %2, %4 : vector<64x8xf32>
    %c0_4 = arith.constant 0 : index
    %c0_5 = arith.constant 0 : index
    %6 = vector.load %arg3[%c0_4, %c0_5] : memref<1x8xf32, #tpu.memory_space<vmem>>, vector<1x8xf32>
    %7 = vector.broadcast %6 : vector<1x8xf32> to vector<64x8xf32>
    %8 = arith.addf %5, %7 : vector<64x8xf32>
    %cst = arith.constant 0.000000e+00 : f32
    %9 = vector.broadcast %cst : f32 to vector<64x8xf32>
    %10 = arith.maximumf %8, %9 : vector<64x8xf32>
    %11 = arith.truncf %10 : vector<64x8xf32> to vector<64x8xbf16>
    %12 = vector.shape_cast %11 : vector<64x8xbf16> to vector<8x8x8xbf16>
    %cst_6 = arith.constant 0.000000e+00 : bf16
    %13 = vector.broadcast %cst_6 : bf16 to vector<1x8x8xbf16>
    %14 = tpu.concatenate %13, %12, %13 in 0 : vector<1x8x8xbf16>, vector<8x8x8xbf16>, vector<1x8x8xbf16> -> vector<10x8x8xbf16>
    %cst_7 = arith.constant 0.000000e+00 : bf16
    %15 = vector.broadcast %cst_7 : bf16 to vector<10x1x8xbf16>
    %16 = tpu.concatenate %15, %14, %15 in 1 : vector<10x1x8xbf16>, vector<10x8x8xbf16>, vector<10x1x8xbf16> -> vector<10x10x8xbf16>
    %c0_8 = arith.constant 0 : index
    %c0_9 = arith.constant 0 : index
    %17 = vector.load %arg4[%c0_8, %c0_9] : memref<72x8xbf16, #tpu.memory_space<vmem>>, vector<72x8xbf16>
    %cst_10 = arith.constant 0.000000e+00 : f32
    %18 = vector.broadcast %cst_10 : f32 to vector<2x8xf32>
    %19 = vector.extract_strided_slice %16 {offsets = [0, 0, 0], sizes = [8, 8, 8], strides = [1, 1, 1]} : vector<10x10x8xbf16> to vector<8x8x8xbf16>
    %20 = vector.extract_strided_slice %16 {offsets = [0, 1, 0], sizes = [8, 8, 8], strides = [1, 1, 1]} : vector<10x10x8xbf16> to vector<8x8x8xbf16>
    %21 = vector.extract_strided_slice %16 {offsets = [0, 2, 0], sizes = [8, 8, 8], strides = [1, 1, 1]} : vector<10x10x8xbf16> to vector<8x8x8xbf16>
    %22 = vector.extract_strided_slice %16 {offsets = [1, 0, 0], sizes = [8, 8, 8], strides = [1, 1, 1]} : vector<10x10x8xbf16> to vector<8x8x8xbf16>
    %23 = vector.extract_strided_slice %16 {offsets = [1, 1, 0], sizes = [8, 8, 8], strides = [1, 1, 1]} : vector<10x10x8xbf16> to vector<8x8x8xbf16>
    %24 = vector.extract_strided_slice %16 {offsets = [1, 2, 0], sizes = [8, 8, 8], strides = [1, 1, 1]} : vector<10x10x8xbf16> to vector<8x8x8xbf16>
    %25 = vector.extract_strided_slice %16 {offsets = [2, 0, 0], sizes = [8, 8, 8], strides = [1, 1, 1]} : vector<10x10x8xbf16> to vector<8x8x8xbf16>
    %26 = vector.extract_strided_slice %16 {offsets = [2, 1, 0], sizes = [8, 8, 8], strides = [1, 1, 1]} : vector<10x10x8xbf16> to vector<8x8x8xbf16>
    %27 = vector.extract_strided_slice %16 {offsets = [2, 2, 0], sizes = [8, 8, 8], strides = [1, 1, 1]} : vector<10x10x8xbf16> to vector<8x8x8xbf16>
    %28 = tpu.concatenate %19, %20, %21, %22, %23, %24, %25, %26, %27 in 2 : vector<8x8x8xbf16>, vector<8x8x8xbf16>, vector<8x8x8xbf16>, vector<8x8x8xbf16>, vector<8x8x8xbf16>, vector<8x8x8xbf16>, vector<8x8x8xbf16>, vector<8x8x8xbf16>, vector<8x8x8xbf16> -> vector<8x8x72xbf16>
    %29 = vector.shape_cast %28 : vector<8x8x72xbf16> to vector<64x72xbf16>
    %cst_11 = arith.constant dense<0.000000e+00> : vector<64x8xf32>
    %30 = tpu.matmul %29, %17, %cst_11 {dimension_numbers = #tpu.dot_dimension_numbers<[1], [0], [0], [1], [0, 0, 1, 1], [], []>} : vector<64x72xbf16>, vector<72x8xbf16>, vector<64x8xf32> -> vector<64x8xf32>
    %cst_12 = arith.constant dense<0.000000e+00> : vector<8xf32>
    %31 = vector.multi_reduction <add>, %30, %cst_12 [0] : vector<64x8xf32> to vector<8xf32>
    %32 = vector.shape_cast %31 : vector<8xf32> to vector<1x8xf32>
    %33 = arith.mulf %30, %30 : vector<64x8xf32>
    %cst_13 = arith.constant dense<0.000000e+00> : vector<8xf32>
    %34 = vector.multi_reduction <add>, %33, %cst_13 [0] : vector<64x8xf32> to vector<8xf32>
    %35 = vector.shape_cast %34 : vector<8xf32> to vector<1x8xf32>
    %36 = tpu.concatenate %32, %35 in 0 : vector<1x8xf32>, vector<1x8xf32> -> vector<2x8xf32>
    %37 = arith.addf %18, %36 : vector<2x8xf32>
    %38 = arith.truncf %30 : vector<64x8xf32> to vector<64x8xbf16>
    %39 = tpu.transpose %38, [1, 0] : vector<64x8xbf16> -> vector<8x64xbf16>
    %c0_14 = arith.constant 0 : index
    %c0_15 = arith.constant 0 : index
    %c0_16 = arith.constant 0 : index
    %40 = vector.load %arg5[%c0_14, %c0_15, %c0_16] : memref<1x8x64xbf16, #tpu.memory_space<vmem>>, vector<1x8x64xbf16>
    %41 = vector.shape_cast %40 : vector<1x8x64xbf16> to vector<8x64xbf16>
    %42 = vector.shape_cast %39 : vector<8x64xbf16> to vector<1x8x64xbf16>
    tpu.vector_store %arg5[%c0_14, %c0_15, %c0_16], %42 {strides = array<i32>} : memref<1x8x64xbf16, #tpu.memory_space<vmem>>, vector<1x8x64xbf16>,
    %c0_17 = arith.constant 0 : index
    %c0_18 = arith.constant 0 : index
    %c0_19 = arith.constant 0 : index
    %43 = vector.load %arg6[%c0_17, %c0_18, %c0_19] : memref<1x2x8xf32, #tpu.memory_space<vmem>>, vector<1x2x8xf32>
    %44 = vector.shape_cast %43 : vector<1x2x8xf32> to vector<2x8xf32>
    %45 = vector.shape_cast %37 : vector<2x8xf32> to vector<1x2x8xf32>
    tpu.vector_store %arg6[%c0_17, %c0_18, %c0_19], %45 {strides = array<i32>} : memref<1x2x8xf32, #tpu.memory_space<vmem>>, vector<1x2x8xf32>,
    return
  }
  func.func @transform_0(%arg0: i32) -> (i32, i32, i32) {
    %c0_i32 = arith.constant 0 : i32
    %c0_i32_0 = arith.constant 0 : i32
    %c0_i32_1 = arith.constant 0 : i32
    return %arg0, %c0_i32, %c0_i32_0 : i32, i32, i32
  }
  func.func @transform_1(%arg0: i32) -> (i32, i32) {
    %c0_i32 = arith.constant 0 : i32
    %c0_i32_0 = arith.constant 0 : i32
    %c0_i32_1 = arith.constant 0 : i32
    return %c0_i32, %c0_i32_0 : i32, i32
  }
  func.func @transform_2(%arg0: i32) -> (i32, i32) {
    %c0_i32 = arith.constant 0 : i32
    %c0_i32_0 = arith.constant 0 : i32
    %c0_i32_1 = arith.constant 0 : i32
    return %c0_i32, %c0_i32_0 : i32, i32
  }
  func.func @transform_3(%arg0: i32) -> (i32, i32) {
    %c0_i32 = arith.constant 0 : i32
    %c0_i32_0 = arith.constant 0 : i32
    %c0_i32_1 = arith.constant 0 : i32
    return %c0_i32, %c0_i32_0 : i32, i32
  }
  func.func @transform_4(%arg0: i32) -> (i32, i32, i32) {
    %c0_i32 = arith.constant 0 : i32
    %c0_i32_0 = arith.constant 0 : i32
    %c0_i32_1 = arith.constant 0 : i32
    return %arg0, %c0_i32, %c0_i32_0 : i32, i32, i32
  }
  func.func @transform_5(%arg0: i32) -> (i32, i32, i32) {
    %c0_i32 = arith.constant 0 : i32
    %c0_i32_0 = arith.constant 0 : i32
    %c0_i32_1 = arith.constant 0 : i32
    return %arg0, %c0_i32, %c0_i32_0 : i32, i32, i32
  }
}

module attributes {stable_mosaic.version = 11 : i64} {
  func.func @_bn2_kernel(%arg0: i32, %arg1: i32, %arg2: memref<1x8x64xbf16, #tpu.memory_space<vmem>>, %arg3: memref<8x1xf32, #tpu.memory_space<vmem>>, %arg4: memref<8x1xf32, #tpu.memory_space<vmem>>, %arg5: memref<1x8x64xf32, #tpu.memory_space<vmem>>) attributes {dimension_semantics = [#tpu.dimension_semantics<parallel>, #tpu.dimension_semantics<parallel>], iteration_bounds = array<i64: 2, 1>, scalar_prefetch = 0 : i64, scratch_operands = 0 : i64, tpu.core_type = #tpu.core_type<tc>, window_params = [{transform_indices = @transform_0, window_bounds = array<i64: 1, 8, 64>}, {pipeline_mode = #tpu.pipeline_mode<synchronous>, transform_indices = @transform_1, window_bounds = array<i64: 8, 1>}, {pipeline_mode = #tpu.pipeline_mode<synchronous>, transform_indices = @transform_2, window_bounds = array<i64: 8, 1>}, {transform_indices = @transform_3, window_bounds = array<i64: 1, 8, 64>}]} {
    %c0 = arith.constant 0 : index
    %c0_0 = arith.constant 0 : index
    %c0_1 = arith.constant 0 : index
    %0 = vector.load %arg2[%c0, %c0_0, %c0_1] : memref<1x8x64xbf16, #tpu.memory_space<vmem>>, vector<1x8x64xbf16>
    %1 = vector.shape_cast %0 : vector<1x8x64xbf16> to vector<8x64xbf16>
    %2 = arith.extf %1 : vector<8x64xbf16> to vector<8x64xf32>
    %c0_2 = arith.constant 0 : index
    %c0_3 = arith.constant 0 : index
    %3 = vector.load %arg3[%c0_2, %c0_3] : memref<8x1xf32, #tpu.memory_space<vmem>>, vector<8x1xf32>
    %4 = vector.broadcast %3 : vector<8x1xf32> to vector<8x64xf32>
    %5 = arith.mulf %2, %4 : vector<8x64xf32>
    %c0_4 = arith.constant 0 : index
    %c0_5 = arith.constant 0 : index
    %6 = vector.load %arg4[%c0_4, %c0_5] : memref<8x1xf32, #tpu.memory_space<vmem>>, vector<8x1xf32>
    %7 = vector.broadcast %6 : vector<8x1xf32> to vector<8x64xf32>
    %8 = arith.addf %5, %7 : vector<8x64xf32>
    %cst = arith.constant 0.000000e+00 : f32
    %9 = vector.broadcast %cst : f32 to vector<8x64xf32>
    %10 = arith.maximumf %8, %9 : vector<8x64xf32>
    %c0_6 = arith.constant 0 : index
    %c0_7 = arith.constant 0 : index
    %c0_8 = arith.constant 0 : index
    %11 = vector.load %arg5[%c0_6, %c0_7, %c0_8] : memref<1x8x64xf32, #tpu.memory_space<vmem>>, vector<1x8x64xf32>
    %12 = vector.shape_cast %11 : vector<1x8x64xf32> to vector<8x64xf32>
    %13 = vector.shape_cast %10 : vector<8x64xf32> to vector<1x8x64xf32>
    tpu.vector_store %arg5[%c0_6, %c0_7, %c0_8], %13 {strides = array<i32>} : memref<1x8x64xf32, #tpu.memory_space<vmem>>, vector<1x8x64xf32>,
    return
  }
  func.func @transform_0(%arg0: i32, %arg1: i32) -> (i32, i32, i32) {
    %c0_i32 = arith.constant 0 : i32
    %c0_i32_0 = arith.constant 0 : i32
    return %arg0, %c0_i32, %arg1 : i32, i32, i32
  }
  func.func @transform_1(%arg0: i32, %arg1: i32) -> (i32, i32) {
    %c0_i32 = arith.constant 0 : i32
    %c0_i32_0 = arith.constant 0 : i32
    %c0_i32_1 = arith.constant 0 : i32
    return %c0_i32, %c0_i32_0 : i32, i32
  }
  func.func @transform_2(%arg0: i32, %arg1: i32) -> (i32, i32) {
    %c0_i32 = arith.constant 0 : i32
    %c0_i32_0 = arith.constant 0 : i32
    %c0_i32_1 = arith.constant 0 : i32
    return %c0_i32, %c0_i32_0 : i32, i32
  }
  func.func @transform_3(%arg0: i32, %arg1: i32) -> (i32, i32, i32) {
    %c0_i32 = arith.constant 0 : i32
    %c0_i32_0 = arith.constant 0 : i32
    return %arg0, %c0_i32, %arg1 : i32, i32, i32
  }
}

</mosaic_0001>

<bundles_post_ra>
// kernel: downscale_block_nchw.5
= control target key start
LH: loop header
LB: loop body
LE: loop exit
PB: predicated region body
PF: predicated region fallthrough
CT: control target
= control target key end

     0   :  { %s370_s12 = smov 0   ;;  %s372_s13 = smov 0   ;;  %s406_s0 = inlined_call_operand.vmem [shape: bf16[2,8,64], index: 0, kind: input, shape index: {}]   ;;  %s407_s1 = inlined_call_operand.vmem [shape: f32[8,1], index: 1, kind: input, shape index: {}]   ;;  %s408_s2 = inlined_call_operand.vmem [shape: f32[8,1], index: 2, kind: input, shape index: {}]   ;;  %s409_s3 = inlined_call_operand.vmem [shape: f32[2,8,64], index: 3, kind: output, shape index: {}]  }
   0x1   :  { %s374_s14 = smov 0  }
   0x2 LB: > { %s25_s15 = sadd.s32 1, %s343_s13  ;;  %p294_p0 = scmp.ge.s32.totalorder %s347_s14, 1  ;;  %s347_s14 = sphi %s374_s14, %s13_s14   ;;  %s343_s13 = sphi %s372_s13, %s411_s13   ;;  %s339_s12 = sphi %s370_s12, %s410_s12  }
   0x3   : > { %p27_p1 = scmp.ge.s32.totalorder %s25_s15, 2  ;;  %p155_p2 = scmp.lt.s32.totalorder %s347_s14, 3 }
   0x5   : > { %s413_s15 = smov (%p27_p1, %s25_s15), 0  ;;  %p156_p3 = pnand %p294_p0, %p155_p2 }
   0x6   : > { %v199_v0 = vld [vmem:[%s407_s1] sm:$0xff] (!%p156_p3)  ;;  %v349_v1 = vmov (!%p156_p3), 0   ;;  %p183_p4 = scmp.lt.s32.totalorder (!%p156_p3), %s339_s12, 1  ;;  %vm214_vm0 = vcmask (!%p156_p3), 523264  }
   0x7   : > { %159 = sbr.rel (%p156_p3) target bundleno = 145 (0x91), region = 32  ;;  %324 = vset.pattern.permute.xlu0 (!%p156_p3), %v349_v1  ;;  %v206_v2 = vld [vmem:[%s408_s2] sm:$0xff] (!%p156_p3) }
   0x8   : > { %202 = vperm.xlu0 (!%p156_p3), %324, %v199_v0  }
   0xc   : > { %209 = vperm.xlu0 (!%p156_p3), %324, %v206_v2  }
   0xe   : > { %s415_s12 = smov (!%p183_p4, %s339_s12), 1 }
   0xf   : > { %s295_s20 = sshll.u32 %s415_s12, 2  ;;  %s296_s24 = sshll.u32 %s415_s12, 3 }
  0x10   : > { %s189_s23 = scalar_lea.vmem %s406_s0, %s295_s20  ;;  %s196_s27 = scalar_lea.vmem %s409_s3, %s296_s24 }
  0x11   : > { %v197_v3 = vld [vmem:[%s189_s23] sm:$0xf] }
  0x12   : > { %v198_v4 = vunpack.c.l.bf16 %v197_v3 }
  0x87   : > { %v203_v5 = vpop.permute.xlu0 %202 }
  0x88   : > { %v205_v6 = vmul.f32 %v203_v5, %v198_v4 }
  0x8b   : > { %v210_v7 = vpop.permute.xlu0 %209 }
  0x8c   : > { %v212_v8 = vadd.f32 %v210_v7, %v205_v6 }
  0x8e   : > { %v213_v9 = vmax.f32 %v212_v8, 0.0 }
  0x90   : > { %215 = vst.msk [vmem:[%s196_s27] sm:$0xff] %vm214_vm0, %v213_v9 }
  0x91 PF: > { %s13_s14 = sadd.s32 1, %s347_s14   ;;  %s410_s12 = smov %s343_s13 }
  0x92   : > { %p10_p5 = scmp.ge.s32.totalorder %s13_s14, 4   ;;  %s411_s13 = smov %s413_s15 }
  0x94   :  { %12 = sbr.rel (!%p10_p5) target bundleno = 2 (0x2), region = 62 }

// kernel: downscale_block_nchw.4
= control target key start
LH: loop header
LB: loop body
LE: loop exit
PB: predicated region body
PF: predicated region fallthrough
CT: control target
= control target key end

     0   :  { %s1223_s18 = smov 0   ;;  %s1623_s0 = inlined_call_operand.vmem [shape: bf16[2,64,8], index: 0, kind: input, shape index: {}]   ;;  %s1624_s1 = inlined_call_operand.vmem [shape: f32[1,8], index: 1, kind: input, shape index: {}]   ;;  %s1625_s2 = inlined_call_operand.vmem [shape: f32[1,8], index: 2, kind: input, shape index: {}]   ;;  %s1626_s3 = inlined_call_operand.vmem [shape: bf16[72,8], index: 3, kind: input, shape index: {}]   ;;  %s1627_s4 = inlined_call_operand.vmem [shape: bf16[2,8,64], index: 4, kind: output, shape index: {0}]   ;;  %s1628_s5 = inlined_call_operand.vmem [shape: f32[2,2,8], index: 5, kind: output, shape index: {1}]  }
   0x1 LB: > { %s1053_s19 = sadd.s32 4294967295, %s1182_s18   ;;  %p1057_p0 = scmp.ge.s32.totalorder %s1182_s18, 1  ;;  %s1182_s18 = sphi %s1223_s18, %s16_s18  }
   0x2   : > { %p190_p1 = scmp.lt.s32.totalorder %s1182_s18, 3 }
   0x4   : > { %p191_p2 = pnand %p1057_p0, %p190_p1 }
   0x5   : > { %vm385_vm0 = vcmask (!%p191_p2), 1040384   ;;  %vm386_vm1 = vsmask.f32 (!%p191_p2), 256  ;;  %vm397_vm2 = vcmask (!%p191_p2), 1044480   ;;  %v1184_v0 = vmov (!%p191_p2), 0   ;;  %p221_p3 = scmp.lt.s32.totalorder (!%p191_p2), %s1053_s19, 1 }
   0x6   : > { %194 = sbr.rel (%p191_p2) target bundleno = 590 (0x24e), region = 36  ;;  %v316_v1 = vrot.slane (!%p191_p2), %v1184_v0, 7  ;;  %vm1232_vm3 = vmand (!%p191_p2), %vm385_vm0, %vm386_vm1  ;;  %vm398_vm4 = vsmask.f32 (!%p191_p2), 4352  ;;  %v1062_v9 = vld [vmem:[%s1624_s1] ss:$0 sm:$0xff] (!%p191_p2) }
   0x7   : > { %vm1236_vm5 = vmand (!%p191_p2), %vm397_vm2, %vm398_vm4  ;;  %s1185_s26 = smov (!%p191_p2), 16   ;;  %v1063_v19 = vld [vmem:[%s1625_s2] ss:$0 sm:$0xff] (!%p191_p2)  ;;  %s1186_s29 = smov (!%p191_p2), 8   ;;  %vm823_vm6 = vcmask (!%p191_p2), 1043456   ;;  %vm627_vm7 = vcmask (!%p191_p2), 64512  }
   0x8   : > { %v388_v4 = vsel (!%p191_p2), %vm1232_vm3, 0, %v316_v1  ;;  %s1187_s30 = smov (!%p191_p2), 24   ;;  %s1188_s6 = smov (!%p191_p2), 32   ;;  %vm644_vm8 = vcmask (!%p191_p2), 130048   ;;  %vm661_vm9 = vcmask (!%p191_p2), 195584   ;;  %vm678_vm10 = vcmask (!%p191_p2), 261120  }
   0x9   : > { %v1246_v5 = vsel (!%p191_p2), %vm1236_vm5, %v388_v4, 0  ;;  %s1189_s7 = smov (!%p191_p2), 40   ;;  %s1190_s8 = smov (!%p191_p2), 48   ;;  %vm695_vm11 = vcmask (!%p191_p2), 326656   ;;  %vm712_vm12 = vcmask (!%p191_p2), 392192   ;;  %vm729_vm13 = vcmask (!%p191_p2), 457728  }
   0xa   : > { %v498_v6 = vrot.slane (!%p191_p2), %v1246_v5, 1  ;;  %v419_v7 = vshrl.u32 (!%p191_p2), %v1246_v5, 16  ;;  %v421_v8 = vshll.u32 (!%p191_p2), %v1246_v5, 16  ;;  %s1191_s9 = smov (!%p191_p2), 56   ;;  %vm746_vm14 = vcmask (!%p191_p2), 523264  }
   0xb   : > { %vm810_vm15 = vcmask (!%p191_p2), 588800   ;;  %vm967_vm1 = vcmask (!%p191_p2), 58368   ;;  %vm965_vm2 = vcmask (!%p191_p2), 519168  }
   0xc   : > { %506 = vrot.lane.b32.xlu0 (!%p191_p2), %v498_v6, %s1185_s26  ;;  %v423_v10 = vrot.slane (!%p191_p2), %v421_v8, 1 }
   0xd   : > { %s1634_s19 = smov (!%p221_p3, %s1053_s19), 1 }
   0xe   : > { %s1087_s20 = sshll.u32 %s1634_s19, 5  ;;  %v1261_v18 = vor.u32 %v423_v10, %v419_v7  ;;  %s1060_s27 = sshll.u32 %s1634_s19, 2 }
   0xf   : > { %s225_s23 = scalar_lea.vmem %s1623_s0, %s1087_s20  ;;  %s1192_s20 = smov 64  }
  0x10   : > { %v1097_v11 = vld [vmem:[%s225_s23] sm:$0xff]   ;;  %v1112_v12 = vld [vmem:[%s225_s23 + $0x8] sm:$0xff]   ;;  %v1113_v13 = vld [vmem:[%s225_s23 + $0x10] sm:$0xff]   ;;  %474 = vrot.lane.b32.xlu0 %v1261_v18, %s1186_s29 }
  0x11   : > { %v1099_v14 = vunpack.c.h.bf16 %v1097_v11  ;;  %v1098_v15 = vunpack.c.l.bf16 %v1097_v11  ;;  %v1103_v16 = vunpack.c.h.bf16 %v1112_v12  ;;  %v1102_v17 = vunpack.c.l.bf16 %v1112_v12  ;;  %v1114_v26 = vld [vmem:[%s225_s23 + $0x18] sm:$0xff]   ;;  %s1061_s23 = sshll.u32 %s1634_s19, 1 }
  0x12   : > { %v1106_v20 = vunpack.c.l.bf16 %v1113_v13  ;;  %v1107_v21 = vunpack.c.h.bf16 %v1113_v13  ;;  %v1111_v29 = vunpack.c.h.bf16 %v1114_v26  ;;  %v1110_v35 = vunpack.c.l.bf16 %v1114_v26 }
  0x13   : > { %v259_v22 = vmul.f32 %v1099_v14, %v1062_v9  ;;  %v258_v23 = vmul.f32 %v1098_v15, %v1062_v9  ;;  %v261_v24 = vmul.f32 %v1103_v16, %v1062_v9  ;;  %v260_v25 = vmul.f32 %v1102_v17, %v1062_v9 }
  0x14   : > { %v262_v27 = vmul.f32 %v1106_v20, %v1062_v9  ;;  %v263_v28 = vmul.f32 %v1107_v21, %v1062_v9  ;;  %v265_v36 = vmul.f32 %v1111_v29, %v1062_v9  ;;  %v264_v48 = vmul.f32 %v1110_v35, %v1062_v9 }
  0x15   : > { %v274_v30 = vadd.f32 %v1063_v19, %v259_v22  ;;  %v273_v31 = vadd.f32 %v1063_v19, %v258_v23  ;;  %v276_v32 = vadd.f32 %v1063_v19, %v261_v24  ;;  %v275_v33 = vadd.f32 %v1063_v19, %v260_v25 }
  0x16   : > { %v277_v34 = vadd.f32 %v1063_v19, %v262_v27  ;;  %v278_v42 = vadd.f32 %v1063_v19, %v263_v28  ;;  %v1268_v43 = vadd.f32 %v1063_v19, %v265_v36  ;;  %v279_v7 = vadd.f32 %v1063_v19, %v264_v48 }
  0x17   : > { %v282_v37 = vmax.f32 %v274_v30, 0.0  ;;  %v281_v38 = vmax.f32 %v273_v31, 0.0  ;;  %v284_v39 = vmax.f32 %v276_v32, 0.0  ;;  %v283_v40 = vmax.f32 %v275_v33, 0.0 }
  0x18   : > { %v285_v41 = vmax.f32 %v277_v34, 0.0  ;;  %v286_v60 = vmax.f32 %v278_v42, 0.0  ;;  %v287_v23 = vmax.f32 %v279_v7, 0.0  ;;  %v288_v29 = vmax.f32 %v1268_v43, 0.0 }
  0x19   : > { %v1089_v44 = vpack.c.bf16 %v282_v37, %v282_v37  ;;  %v1088_v45 = vpack.c.bf16 %v281_v38, %v281_v38  ;;  %v1091_v46 = vpack.c.bf16 %v284_v39, %v284_v39  ;;  %v1090_v47 = vpack.c.bf16 %v283_v40, %v283_v40 }
  0x1a   : > { %v1092_v59 = vpack.c.bf16 %v285_v41, %v285_v41  ;;  %v1093_v11 = vpack.c.bf16 %v286_v60, %v286_v60  ;;  %v1094_v33 = vpack.c.bf16 %v287_v23, %v287_v23  ;;  %v1095_v40 = vpack.c.bf16 %v288_v29, %v288_v29 }
  0x1b   : > { %v328_v49 = vshrl.u32 %v1089_v44, 16  ;;  %v331_v50 = vshll.u32 %v1089_v44, 16  ;;  %v321_v51 = vshrl.u32 %v1088_v45, 16  ;;  %v324_v52 = vshll.u32 %v1088_v45, 16 }
  0x1c   : > { %v342_v53 = vshrl.u32 %v1091_v46, 16  ;;  %v345_v54 = vshll.u32 %v1091_v46, 16  ;;  %v335_v55 = vshrl.u32 %v1090_v47, 16  ;;  %v338_v56 = vshll.u32 %v1090_v47, 16 }
  0x1d   : > { %v330_v57 = vrot.slane %v328_v49, 7  ;;  %v323_v58 = vrot.slane %v321_v51, 7  ;;  %v349_v10 = vshrl.u32 %v1092_v59, 16  ;;  %v352_v21 = vshll.u32 %v1092_v59, 16 }
  0x1e   : > { %v344_v61 = vrot.slane %v342_v53, 7  ;;  %v337_v62 = vrot.slane %v335_v55, 7  ;;  %v356_v22 = vshrl.u32 %v1093_v11, 16  ;;  %v359_v32 = vshll.u32 %v1093_v11, 16 }
  0x1f   : > { %v333_v63 = vor.u32 %v331_v50, %v330_v57  ;;  %v326_v0 = vor.u32 %v324_v52, %v323_v58  ;;  %v351_v20 = vrot.slane %v349_v10, 7  ;;  %v363_v43 = vshrl.u32 %v1094_v33, 16 }
  0x20   : > { %v347_v1 = vor.u32 %v345_v54, %v344_v61  ;;  %v340_v4 = vor.u32 %v338_v56, %v337_v62  ;;  %v358_v31 = vrot.slane %v356_v22, 7  ;;  %v370_v45 = vshrl.u32 %v1095_v40, 16 }
  0x21   : > { %v390_v8 = vsel %vm1232_vm3, 0, %v333_v63  ;;  %v389_v9 = vsel %vm1232_vm3, 0, %v326_v0  ;;  %v354_v30 = vor.u32 %v352_v21, %v351_v20  ;;  %v373_v46 = vshll.u32 %v1095_v40, 16 }
  0x22   : > { %v1276_v12 = vsel %vm1236_vm5, %v390_v8, 0  ;;  %v1280_v13 = vsel %vm1236_vm5, %v389_v9, 0  ;;  %v392_v14 = vsel %vm1232_vm3, 0, %v347_v1  ;;  %v391_v15 = vsel %vm1232_vm3, 0, %v340_v4 }
  0x23   : > { %525 = vrot.lane.b32.xlu1 %v1276_v12, %s1187_s30  ;;  %523 = vrot.lane.b32.xlu0 %v1280_v13, %s1187_s30  ;;  %v1292_v16 = vsel %vm1236_vm5, %v392_v14, 0  ;;  %v1296_v17 = vsel %vm1236_vm5, %v391_v15, 0  ;;  %v428_v19 = vshll.u32 %v1280_v13, 16  ;;  %v1300_v24 = vrot.slane %v1276_v12, 1 }
  0x24   : > { %v499_v25 = vrot.slane %v1280_v13, 1  ;;  %v426_v26 = vshrl.u32 %v1280_v13, 16  ;;  %v435_v28 = vshll.u32 %v1276_v12, 16  ;;  %v1311_v34 = vrot.slane %v1296_v17, 1 }
  0x25   : > { %v430_v27 = vrot.slane %v428_v19, 1  ;;  %v433_v35 = vshrl.u32 %v1276_v12, 16  ;;  %v442_v38 = vshll.u32 %v1296_v17, 16  ;;  %v449_v39 = vshll.u32 %v1292_v16, 16 }
  0x26   : > { %v437_v37 = vrot.slane %v435_v28, 1  ;;  %v393_v41 = vsel %vm1232_vm3, 0, %v354_v30  ;;  %v361_v42 = vor.u32 %v359_v32, %v358_v31  ;;  %v440_v44 = vshrl.u32 %v1296_v17, 16  ;;  %v1174_v28 = vld [vmem:[%s1626_s3 + $0x18] sm:$0xff]   ;;  %v1175_v30 = vld [vmem:[%s1626_s3 + $0x20] ss:$0 sps:$4 sm:$0xff]  }
  0x27   : > { %529 = vrot.lane.b32.xlu1 %v1292_v16, %s1187_s30  ;;  %527 = vrot.lane.b32.xlu0 %v1296_v17, %s1187_s30  ;;  %v431_v36 = vor.u32 %v430_v27, %v426_v26  ;;  %v444_v48 = vrot.slane %v442_v38, 1  ;;  %v447_v49 = vshrl.u32 %v1292_v16, 16  ;;  %v451_v50 = vrot.slane %v449_v39, 1  ;;  %v1172_v26 = vld [vmem:[%s1626_s3 + $0x8] sm:$0xff]   ;;  %v1173_v27 = vld [vmem:[%s1626_s3 + $0x10] sm:$0xff]  }
  0x28   : > { %v438_v47 = vor.u32 %v437_v37, %v433_v35  ;;  %v1328_v51 = vsel %vm1236_vm5, %v393_v41, 0  ;;  %v372_v52 = vrot.slane %v370_v45, 7  ;;  %v394_v53 = vsel %vm1232_vm3, 0, %v361_v42 }
  0x29   : > { %v365_v54 = vrot.slane %v363_v43, 7  ;;  %v366_v55 = vshll.u32 %v1094_v33, 16  ;;  %v445_v57 = vor.u32 %v444_v48, %v440_v44  ;;  %v1334_v58 = vor.u32 %v451_v50, %v447_v49 }
  0x2a   : > { %v375_v56 = vor.u32 %v373_v46, %v372_v52  ;;  %v456_v59 = vshll.u32 %v1328_v51, 16  ;;  %v1339_v60 = vsel %vm1236_vm5, %v394_v53, 0  ;;  %v454_v0 = vshrl.u32 %v1328_v51, 16 }
  0x2b   : > { %510 = vrot.lane.b32.xlu0 %v1300_v24, %s1185_s26  ;;  %508 = vrot.lane.b32.xlu1 %v499_v25, %s1185_s26  ;;  %v368_v62 = vor.u32 %v366_v55, %v365_v54  ;;  %v463_v4 = vshll.u32 %v1339_v60, 16  ;;  %v461_v9 = vshrl.u32 %v1339_v60, 16  ;;  %v1374_v3 = vrot.slane %v1292_v16, 1 }
  0x2c   : > { %v396_v61 = vsel %vm1232_vm3, 0, %v375_v56  ;;  %v458_v1 = vrot.slane %v456_v59, 1  ;;  %v1388_v21 = vrot.slane %v1328_v51, 1  ;;  %v1395_v22 = vrot.slane %v1339_v60, 1 }
  0x2d   : > { %v1345_v63 = vsel %vm1236_vm5, %v396_v61, 0  ;;  %v395_v7 = vsel %vm1232_vm3, 0, %v368_v62  ;;  %v465_v10 = vrot.slane %v463_v4, 1  ;;  %v825_v32 = vsel %vm823_vm6, %v1175_v30, 0 }
  0x2e   : > { %v1356_v8 = vor.u32 %v458_v1, %v454_v0  ;;  %v1361_v11 = vsel %vm1236_vm5, %v395_v7, 0  ;;  %v542_v29 = vshll.u32 %v1345_v63, 16  ;;  %v540_v31 = vshrl.u32 %v1345_v63, 16 }
  0x2f   : > { %512 = vrot.lane.b32.xlu1 %v1311_v34, %s1185_s26  ;;  %476 = vrot.lane.b32.xlu0 %v431_v36, %s1186_s29  ;;  %v1366_v2 = vor.u32 %v465_v10, %v461_v9  ;;  %v470_v14 = vshll.u32 %v1361_v11, 16  ;;  %v468_v15 = vshrl.u32 %v1361_v11, 16  ;;  %v1406_v23 = vrot.slane %v1361_v11, 1 }
  0x31   : > { %v472_v19 = vrot.slane %v470_v14, 1 }
  0x33   : > { %478 = vrot.lane.b32.xlu1 %v438_v47, %s1186_s29  ;;  %546 = vrot.lane.b32.xlu0 %v431_v36, %s1188_s6  ;;  %v1381_v20 = vor.u32 %v472_v19, %v468_v15 }
  0x37   : > { %480 = vrot.lane.b32.xlu1 %v445_v57, %s1186_s29  ;;  %482 = vrot.lane.b32.xlu0 %v1334_v58, %s1186_s29 }
  0x3b   : > { %548 = vrot.lane.b32.xlu1 %v438_v47, %s1188_s6  ;;  %550 = vrot.lane.b32.xlu0 %v445_v57, %s1188_s6 }
  0x3f   : > { %484 = vrot.lane.b32.xlu1 %v1356_v8, %s1186_s29  ;;  %563 = vrot.lane.b32.xlu0 %v499_v25, %s1189_s7  ;;  %v1171_v25 = vld [vmem:[%s1626_s3] sm:$0xff]  }
  0x40   : > { %1124 = vmatprep.subr.bf16.mxu0 %v1171_v25  ;;  %1142 = vmatprep.subr.bf16.mxu1 %v1171_v25 }
  0x41   : > { %1125 = vmatpush3.bf16.msra.mxu0 %v1171_v25  ;;  %1147 = vmatpush3.bf16.msra.mxu1 %v1171_v25 }
  0x42   : > { %1126 = vmatprep.subr.bf16.mxu0 %v1172_v26  ;;  %1143 = vmatprep.subr.bf16.mxu1 %v1172_v26 }
  0x43   : > { %552 = vrot.lane.b32.xlu1 %v1334_v58, %s1188_s6  ;;  %486 = vrot.lane.b32.xlu0 %v1366_v2, %s1186_s29 }
  0x45   : > { %1127 = vmatpush3.bf16.msra.mxu0 %v1172_v26  ;;  %1148 = vmatpush3.bf16.msra.mxu1 %v1172_v26 }
  0x46   : > { %1128 = vmatprep.subr.bf16.mxu0 %v1173_v27  ;;  %1144 = vmatprep.subr.bf16.mxu1 %v1173_v27 }
  0x47   : > { %565 = vrot.lane.b32.xlu1 %v1300_v24, %s1189_s7  ;;  %514 = vrot.lane.b32.xlu0 %v1374_v3, %s1185_s26 }
  0x49   : > { %1129 = vmatpush3.bf16.msra.mxu0 %v1173_v27  ;;  %1149 = vmatpush3.bf16.msra.mxu1 %v1173_v27 }
  0x4a   : > { %1130 = vmatprep.subr.bf16.mxu0 %v1174_v28  ;;  %1145 = vmatprep.subr.bf16.mxu1 %v1174_v28 }
  0x4b   : > { %488 = vrot.lane.b32.xlu1 %v1381_v20, %s1186_s29  ;;  %567 = vrot.lane.b32.xlu0 %v1311_v34, %s1189_s7 }
  0x4d   : > { %1131 = vmatpush3.bf16.msra.mxu0 %v1174_v28  ;;  %1150 = vmatpush3.bf16.msra.mxu1 %v1174_v28 }
  0x4e   : > { %1152 = vmatprep.subr.msk.bf16.mxu0 %vm823_vm6, %v1175_v30  ;;  %1153 = vmatprep.subr.msk.bf16.mxu1 %vm823_vm6, %v1175_v30 }
  0x4f   : > { %516 = vrot.lane.b32.xlu1 %v1388_v21, %s1185_s26  ;;  %579 = vrot.lane.b32.xlu0 %v1276_v12, %s1190_s8 }
  0x51   : > { %1133 = vmatpush3.bf16.msra.mxu0 %v825_v32  ;;  %1151 = vmatpush3.bf16.msra.mxu1 %v825_v32 }
  0x53   : > { %569 = vrot.lane.b32.xlu1 %v1374_v3, %s1189_s7  ;;  %518 = vrot.lane.b32.xlu0 %v1395_v22, %s1185_s26 }
  0x57   : > { %581 = vrot.lane.b32.xlu1 %v1296_v17, %s1190_s8  ;;  %531 = vrot.lane.b32.xlu0 %v1328_v51, %s1187_s30 }
  0x5b   : > { %520 = vrot.lane.b32.xlu1 %v1406_v23, %s1185_s26  ;;  %583 = vrot.lane.b32.xlu0 %v1292_v16, %s1190_s8  ;;  %s233_s26 = scalar_lea.vmem %s1628_s5, %s1061_s23 }
  0x5f   : > { %533 = vrot.lane.b32.xlu1 %v1339_v60, %s1187_s30  ;;  %595 = vrot.lane.b32.xlu0 %v438_v47, %s1191_s9 }
  0x63   : > { %585 = vrot.lane.b32.xlu1 %v1328_v51, %s1190_s8  ;;  %535 = vrot.lane.b32.xlu0 %v1361_v11, %s1187_s30 }
  0x67   : > { %597 = vrot.lane.b32.xlu1 %v445_v57, %s1191_s9  ;;  %554 = vrot.lane.b32.xlu0 %v1356_v8, %s1188_s6 }
  0x6b   : > { %537 = vrot.lane.b32.xlu1 %v1345_v63, %s1187_s30  ;;  %599 = vrot.lane.b32.xlu0 %v1334_v58, %s1191_s9  ;;  %s229_s30 = scalar_lea.vmem %s1627_s4, %s1060_s27 }
  0x6f   : > { %556 = vrot.lane.b32.xlu1 %v1366_v2, %s1188_s6  ;;  %611 = vrot.lane.b32.xlu0 %v1300_v24, %s1192_s20  ;;  %v544_v24 = vrot.slane %v542_v29, 1 }
  0x71   : > { %v545_v33 = vor.u32 %v544_v24, %v540_v31 }
  0x73   : > { %601 = vrot.lane.b32.xlu1 %v1356_v8, %s1191_s9  ;;  %558 = vrot.lane.b32.xlu0 %v1381_v20, %s1188_s6 }
  0x77   : > { %613 = vrot.lane.b32.xlu1 %v1311_v34, %s1192_s20  ;;  %571 = vrot.lane.b32.xlu0 %v1388_v21, %s1189_s7  ;;  %v562_v34 = vrot.slane %v1345_v63, 1 }
  0x7b   : > { %560 = vrot.lane.b32.xlu1 %v545_v33, %s1188_s6  ;;  %615 = vrot.lane.b32.xlu0 %v1374_v3, %s1192_s20 }
  0x7e   : > { %v507_v35 = vpop.permute.xlu0 %506 }
  0x7f   : > { %573 = vrot.lane.b32.xlu1 %v1395_v22, %s1189_s7  ;;  %575 = vrot.lane.b32.xlu0 %v1406_v23, %s1189_s7 }
  0x82   : > { %v475_v36 = vpop.permute.xlu0 %474 }
  0x83   : > { %617 = vrot.lane.b32.xlu1 %v1388_v21, %s1192_s20  ;;  %587 = vrot.lane.b32.xlu0 %v1339_v60, %s1190_s8  ;;  %v629_v37 = vsel %vm627_vm7, %v1246_v5, %v475_v36 }
  0x84   : > { %v646_v38 = vsel %vm644_vm8, %v629_v37, %v507_v35 }
  0x87   : > { %577 = vrot.lane.b32.xlu1 %v562_v34, %s1189_s7  ;;  %591 = vrot.lane.b32.xlu0 %v1345_v63, %s1190_s8 }
  0x8b   : > { %589 = vrot.lane.b32.xlu1 %v1361_v11, %s1190_s8  ;;  %603 = vrot.lane.b32.xlu0 %v1366_v2, %s1191_s9 }
  0x8f   : > { %593 = vrot.lane.b32.xlu1 %v1246_v5, %s1190_s8  ;;  %607 = vrot.lane.b32.xlu0 %v545_v33, %s1191_s9 }
  0x93   : > { %605 = vrot.lane.b32.xlu1 %v1381_v20, %s1191_s9  ;;  %619 = vrot.lane.b32.xlu0 %v1395_v22, %s1192_s20 }
  0x95   : > { %v526_v39 = vpop.permute.xlu1 %525  ;;  %v524_v40 = vpop.permute.xlu0 %523 }
  0x96   : > { %v663_v41 = vsel %vm661_vm9, %v646_v38, %v524_v40 }
  0x97   : > { %609 = vrot.lane.b32.xlu1 %v1261_v18, %s1191_s9  ;;  %623 = vrot.lane.b32.xlu0 %v562_v34, %s1192_s20 }
  0x99   : > { %v530_v42 = vpop.permute.xlu1 %529  ;;  %v528_v43 = vpop.permute.xlu0 %527 }
  0x9b   : > { %621 = vrot.lane.b32.xlu1 %v1406_v23, %s1192_s20 }
  0x9d   : > { %v511_v44 = vpop.permute.xlu0 %510  ;;  %v509_v45 = vpop.permute.xlu1 %508 }
  0x9f   : > { %625 = vrot.lane.b32.xlu1 %v498_v6, %s1192_s20 }
  0xa1   : > { %v513_v46 = vpop.permute.xlu1 %512  ;;  %v477_v47 = vpop.permute.xlu0 %476 }
  0xa2   : > { %v631_v48 = vsel %vm627_vm7, %v1280_v13, %v477_v47 }
  0xa3   : > { %v648_v18 = vsel %vm644_vm8, %v631_v48, %v509_v45 }
  0xa4   : > { %v665_v49 = vsel %vm661_vm9, %v648_v18, %v526_v39 }
  0xa5   : > { %v479_v50 = vpop.permute.xlu1 %478  ;;  %v547_v52 = vpop.permute.xlu0 %546 }
  0xa6   : > { %v633_v53 = vsel %vm627_vm7, %v1276_v12, %v479_v50  ;;  %v680_v33 = vsel %vm678_vm10, %v663_v41, %v547_v52 }
  0xa7   : > { %v650_v54 = vsel %vm644_vm8, %v633_v53, %v511_v44 }
  0xa8   : > { %v1501_v55 = vsel %vm661_vm9, %v650_v54, %v528_v43 }
  0xa9   : > { %v481_v5 = vpop.permute.xlu1 %480  ;;  %v483_v6 = vpop.permute.xlu0 %482 }
  0xaa   : > { %v635_v56 = vsel %vm627_vm7, %v1296_v17, %v481_v5  ;;  %v637_v0 = vsel %vm627_vm7, %v1292_v16, %v483_v6 }
  0xab   : > { %v652_v13 = vsel %vm644_vm8, %v635_v56, %v513_v46 }
  0xac   : > { %v669_v57 = vsel %vm661_vm9, %v652_v13, %v530_v42 }
  0xad   : > { %v549_v58 = vpop.permute.xlu1 %548  ;;  %v551_v59 = vpop.permute.xlu0 %550 }
  0xae   : > { %v682_v35 = vsel %vm678_vm10, %v665_v49, %v549_v58  ;;  %v684_v49 = vsel %vm678_vm10, %v1501_v55, %v551_v59 }
  0xb1   : > { %v485_v61 = vpop.permute.xlu1 %484  ;;  %v564_v62 = vpop.permute.xlu0 %563 }
  0xb2   : > { %v639_v9 = vsel %vm627_vm7, %v1328_v51, %v485_v61  ;;  %v697_v34 = vsel %vm695_vm11, %v680_v33, %v564_v62 }
  0xb5   : > { %v553_v63 = vpop.permute.xlu1 %552  ;;  %v1507_v12 = vpop.permute.xlu0 %486 }
  0xb6   : > { %v686_v50 = vsel %vm678_vm10, %v669_v57, %v553_v63 }
  0xb9   : > { %v566_v1 = vpop.permute.xlu1 %565  ;;  %v515_v4 = vpop.permute.xlu0 %514 }
  0xba   : > { %v1512_v7 = vsel %vm644_vm8, %v637_v0, %v515_v4  ;;  %v699_v36 = vsel %vm695_vm11, %v682_v35, %v566_v1 }
  0xbd   : > { %v1514_v17 = vpop.permute.xlu1 %488  ;;  %v568_v8 = vpop.permute.xlu0 %567 }
  0xbe   : > { %v701_v52 = vsel %vm695_vm11, %v684_v49, %v568_v8 }
  0xc1   : > { %v517_v10 = vpop.permute.xlu1 %516  ;;  %v580_v2 = vpop.permute.xlu0 %579 }
  0xc2   : > { %v1519_v14 = vsel %vm644_vm8, %v639_v9, %v517_v10  ;;  %v714_v37 = vsel %vm712_vm12, %v697_v34, %v580_v2 }
  0xc5   : > { %v570_v3 = vpop.permute.xlu1 %569  ;;  %v1521_v15 = vpop.permute.xlu0 %518 }
  0xc6   : > { %v703_v53 = vsel %vm695_vm11, %v686_v50, %v570_v3 }
  0xc9   : > { %v582_v16 = vpop.permute.xlu1 %581  ;;  %v532_v19 = vpop.permute.xlu0 %531 }
  0xca   : > { %v716_v38 = vsel %vm712_vm12, %v699_v36, %v582_v16  ;;  %v671_v9 = vsel %vm661_vm9, %v1512_v7, %v532_v19 }
  0xcd   : > { %v1523_v20 = vpop.permute.xlu1 %520  ;;  %v584_v21 = vpop.permute.xlu0 %583 }
  0xce   : > { %v718_v54 = vsel %vm712_vm12, %v701_v52, %v584_v21 }
  0xd1   : > { %v534_v22 = vpop.permute.xlu1 %533  ;;  %v596_v23 = vpop.permute.xlu0 %595 }
  0xd2   : > { %v731_v39 = vsel %vm729_vm13, %v714_v37, %v596_v23  ;;  %v673_v10 = vsel %vm661_vm9, %v1519_v14, %v534_v22  ;;  %v641_v23 = vsel %vm627_vm7, %v1339_v60, %v1507_v12 }
  0xd3   : > { %v658_v14 = vsel %vm644_vm8, %v641_v23, %v1521_v15 }
  0xd5   : > { %v586_v25 = vpop.permute.xlu1 %585  ;;  %v1525_v26 = vpop.permute.xlu0 %535 }
  0xd6   : > { %v720_v5 = vsel %vm712_vm12, %v703_v53, %v586_v25  ;;  %v643_v25 = vsel %vm627_vm7, %v1361_v11, %v1514_v17  ;;  %v675_v60 = vsel %vm661_vm9, %v658_v14, %v1525_v26 }
  0xd7   : > { %v660_v19 = vsel %vm644_vm8, %v643_v25, %v1523_v20 }
  0xd9   : > { %v598_v27 = vpop.permute.xlu1 %597  ;;  %v555_v51 = vpop.permute.xlu0 %554 }
  0xda   : > { %v733_v40 = vsel %vm729_vm13, %v716_v38, %v598_v27  ;;  %v688_v16 = vsel %vm678_vm10, %v671_v9, %v555_v51 }
  0xdd   : > { %v1527_v28 = vpop.permute.xlu1 %537  ;;  %v600_v29 = vpop.permute.xlu0 %599 }
  0xde   : > { %v735_v6 = vsel %vm729_vm13, %v718_v54, %v600_v29  ;;  %v677_v11 = vsel %vm661_vm9, %v660_v19, %v1527_v28 }
  0xe1   : > { %v557_v30 = vpop.permute.xlu1 %556  ;;  %v612_v31 = vpop.permute.xlu0 %611 }
  0xe2   : > { %v748_v41 = vsel %vm746_vm14, %v731_v39, %v612_v31  ;;  %v690_v21 = vsel %vm678_vm10, %v673_v10, %v557_v30 }
  0xe5   : > { %v602_v24 = vpop.permute.xlu1 %601  ;;  %v1529_v32 = vpop.permute.xlu0 %558 }
  0xe6   : > { %v737_v56 = vsel %vm729_vm13, %v720_v5, %v602_v24  ;;  %v692_v15 = vsel %vm678_vm10, %v675_v60, %v1529_v32 }
  0xe9   : > { %v614_v42 = vpop.permute.xlu1 %613  ;;  %v572_v43 = vpop.permute.xlu0 %571 }
  0xea   : > { %v750_v44 = vsel %vm746_vm14, %v733_v40, %v614_v42  ;;  %v705_v27 = vsel %vm695_vm11, %v688_v16, %v572_v43 }
  0xeb   : > { %v1072_v45 = vcombine.low %v748_v41, %v750_v44 }
  0xed   : > { %v561_v46 = vpop.permute.xlu1 %560  ;;  %1134 = vmatprep.mubr.msk.bf16.mxu0 %vm810_vm15, %v1072_v45  ;;  %v616_v47 = vpop.permute.xlu0 %615 }
  0xee   : > { %v752_v61 = vsel %vm746_vm14, %v735_v6, %v616_v47  ;;  %v694_v20 = vsel %vm678_vm10, %v677_v11, %v561_v46 }
  0xf1   : > { %v574_v48 = vpop.permute.xlu1 %573  ;;  %v576_v18 = vpop.permute.xlu0 %575 }
  0xf2   : > { %v707_v7 = vsel %vm695_vm11, %v690_v21, %v574_v48  ;;  %v709_v24 = vsel %vm695_vm11, %v692_v15, %v576_v18 }
  0xf5   : > { %v618_v13 = vpop.permute.xlu1 %617  ;;  %v588_v58 = vpop.permute.xlu0 %587 }
  0xf6   : > { %v754_v55 = vsel %vm746_vm14, %v737_v56, %v618_v13  ;;  %v722_v22 = vsel %vm712_vm12, %v705_v27, %v588_v58 }
  0xf7   : > { %v1073_v59 = vcombine.low %v752_v61, %v754_v55 }
  0xf9   : > { %v578_v57 = vpop.permute.xlu1 %577  ;;  %1135 = vmatmul.mubr.msk.bf16.vlgmr.msra.gmra.mrb[0].mxu0 %vm810_vm15, %v1073_v59  ;;  %v592_v62 = vpop.permute.xlu0 %591 }
  0xfa   : > { %v711_v26 = vsel %vm695_vm11, %v694_v20, %v578_v57  ;;  %v726_v35 = vsel %vm712_vm12, %v709_v24, %v592_v62 }
  0xfd   : > { %v590_v63 = vpop.permute.xlu1 %589  ;;  %v604_v0 = vpop.permute.xlu0 %603 }
  0xfe   : > { %v724_v51 = vsel %vm712_vm12, %v707_v7, %v590_v63  ;;  %v739_v12 = vsel %vm729_vm13, %v722_v22, %v604_v0 }
 0x101   : > { %v594_v1 = vpop.permute.xlu1 %593  ;;  %v608_v4 = vpop.permute.xlu0 %607 }
 0x102   : > { %v728_v34 = vsel %vm712_vm12, %v711_v26, %v594_v1  ;;  %v743_v36 = vsel %vm729_vm13, %v726_v35, %v608_v4 }
 0x105   : > { %v606_v8 = vpop.permute.xlu1 %605  ;;  %v620_v2 = vpop.permute.xlu0 %619 }
 0x106   : > { %v741_v17 = vsel %vm729_vm13, %v724_v51, %v606_v8  ;;  %v756_v30 = vsel %vm746_vm14, %v739_v12, %v620_v2 }
 0x109   : > { %v610_v3 = vpop.permute.xlu1 %609  ;;  %v624_v33 = vpop.permute.xlu0 %623 }
 0x10a   : > { %v745_v32 = vsel %vm729_vm13, %v728_v34, %v610_v3  ;;  %v760_v38 = vsel %vm746_vm14, %v743_v36, %v624_v33 }
 0x10d   : > { %v622_v29 = vpop.permute.xlu1 %621 }
 0x10e   : > { %v758_v31 = vsel %vm746_vm14, %v741_v17, %v622_v29 }
 0x10f   : > { %v1074_v28 = vcombine.low %v756_v30, %v758_v31 }
 0x111   : > { %v626_v37 = vpop.permute.xlu1 %625  ;;  %1138 = vmatprep.mubr.msk.bf16.mxu1 %vm810_vm15, %v1074_v28 }
 0x112   : > { %v762_v39 = vsel %vm746_vm14, %v745_v32, %v626_v37 }
 0x113   : > { %v1075_v40 = vcombine.low %v760_v38, %v762_v39 }
 0x115   : > { %1139 = vmatmul.mubr.msk.bf16.vlgmr.msra.gmra.mrb[0].mxu1 %vm810_vm15, %v1075_v40 }
 0x1cc   : > { %v1136_v42 = vpop.f32.mrb[0].mxu0 }
 0x1cd   : > { %v861_v43 = vpop.f32.mrb[1].mxu0  ;;  %v915_v45 = vmul.f32 %v1136_v42, %v1136_v42  ;;  %v895_v53 = vsel %vm627_vm7, %v1136_v42, 0.0 }
 0x1ce   : > { %v913_v41 = vmul.f32 %v861_v43, %v861_v43  ;;  %v1137_v44 = vpop.f32.mrb[2].mxu0  ;;  %v892_v48 = vsel %vm627_vm7, %v861_v43, 0.0 }
 0x1cf   : > { %v946_v46 = vpack.c.bf16 %v1137_v44, %v1136_v42  ;;  %v864_v47 = vpop.f32.mrb[3].mxu0  ;;  %v916_v5 = vmul.f32 %v1137_v44, %v1137_v44  ;;  %v924_v58 = vsel %vm627_vm7, %v915_v45, 0.0  ;;  %v897_v61 = vsel %vm627_vm7, %v1137_v44, 0.0 }
 0x1d0   : > { %v893_v18 = vsel %vm627_vm7, %v864_v47, 0.0  ;;  %v914_v49 = vmul.f32 %v864_v47, %v864_v47  ;;  %v945_v50 = vpack.c.bf16 %v864_v47, %v861_v43  ;;  %v921_v54 = vsel %vm627_vm7, %v913_v41, 0.0 }
 0x1d1   : > { %v894_v52 = vadd.f32 %v893_v18, %v892_v48  ;;  %v926_v57 = vsel %vm627_vm7, %v916_v5, 0.0 }
 0x1d2   : > { %v922_v6 = vsel %vm627_vm7, %v914_v49, 0.0  ;;  %949 = vxpose.xlu0.c.b16.start [1/4] (short) (narrow) %v945_v50, 16 }
 0x1d3   : > { %v896_v56 = vadd.f32 %v895_v53, %v894_v52  ;;  %v923_v13 = vadd.f32 %v922_v6, %v921_v54 }
 0x1d5   : > { %v925_v55 = vadd.f32 %v924_v58, %v923_v13  ;;  %v898_v59 = vadd.f32 %v897_v61, %v896_v56 }
 0x1d6   : > { %950 = vxpose.xlu0.c.b16.cont [2/4] (short) (narrow) %v946_v46, 16 }
 0x1d7   : > { %v927_v62 = vadd.f32 %v926_v57, %v925_v55 }
 0x1e8   : > { %v1140_v63 = vpop.f32.mrb[0].mxu1 }
 0x1e9   : > { %v877_v0 = vpop.f32.mrb[1].mxu1  ;;  %v919_v9 = vmul.f32 %v1140_v63, %v1140_v63  ;;  %v903_v14 = vsel %vm627_vm7, %v1140_v63, 0.0 }
 0x1ea   : > { %v899_v1 = vsel %vm627_vm7, %v877_v0, 0.0  ;;  %v917_v4 = vmul.f32 %v877_v0, %v877_v0  ;;  %v1141_v8 = vpop.f32.mrb[2].mxu1 }
 0x1eb   : > { %v900_v10 = vadd.f32 %v899_v1, %v898_v59  ;;  %v880_v2 = vpop.f32.mrb[3].mxu1  ;;  %v948_v16 = vpack.c.bf16 %v1141_v8, %v1140_v63  ;;  %v920_v19 = vmul.f32 %v1141_v8, %v1141_v8  ;;  %v932_v11 = vsel %vm627_vm7, %v919_v9, 0.0 }
 0x1ec   : > { %v928_v3 = vsel %vm627_vm7, %v917_v4, 0.0  ;;  %v901_v21 = vsel %vm627_vm7, %v880_v2, 0.0  ;;  %v918_v23 = vmul.f32 %v880_v2, %v880_v2  ;;  %v947_v7 = vpack.c.bf16 %v880_v2, %v877_v0 }
 0x1ed   : > { %v929_v25 = vadd.f32 %v928_v3, %v927_v62  ;;  %v902_v27 = vadd.f32 %v901_v21, %v900_v10  ;;  %v905_v12 = vsel %vm627_vm7, %v1141_v8, 0.0  ;;  %v934_v15 = vsel %vm627_vm7, %v920_v19, 0.0 }
 0x1ee   : > { %v930_v22 = vsel %vm627_vm7, %v918_v23, 0.0  ;;  %951 = vxpose.xlu0.c.b16.cont [3/4] (short) (narrow) %v947_v7, 16 }
 0x1ef   : > { %v904_v51 = vadd.f32 %v903_v14, %v902_v27  ;;  %v931_v60 = vadd.f32 %v930_v22, %v929_v25 }
 0x1f1   : > { %v906_v17 = vadd.f32 %v905_v12, %v904_v51  ;;  %v933_v29 = vadd.f32 %v932_v11, %v931_v60 }
 0x1f2   : > { %952 = vxpose.xlu0.c.b16.end [4/4] (short) (narrow) %v948_v16, 16 }
 0x1f3   : > { %v907_v20 = vrot.slane %v906_v17, 4  ;;  %v935_v30 = vadd.f32 %v934_v15, %v933_v29 }
 0x1f5   : > { %v908_v31 = vadd.f32 %v907_v20, %v906_v17  ;;  %v936_v24 = vrot.slane %v935_v30, 4 }
 0x1f7   : > { %v909_v26 = vrot.slane %v908_v31, 2  ;;  %v937_v33 = vadd.f32 %v936_v24, %v935_v30 }
 0x1f9   : > { %v910_v28 = vadd.f32 %v909_v26, %v908_v31  ;;  %v938_v35 = vrot.slane %v937_v33, 2 }
 0x1fb   : > { %v911_v34 = vrot.slane %v910_v28, 1  ;;  %v939_v36 = vadd.f32 %v938_v35, %v937_v33 }
 0x1fd   : > { %v940_v32 = vrot.slane %v939_v36, 1  ;;  %v912_v37 = vadd.f32 %v911_v34, %v910_v28 }
 0x1ff   : > { %v941_v38 = vadd.f32 %v940_v32, %v939_v36 }
 0x201   : > { %v943_v39 = vsel %vm385_vm0, %v912_v37, %v941_v38 }
 0x202   : > { %968 = vst.msk [vmem:[%s233_s26] sm:$0x3] %vm967_vm1, %v943_v39 }
 0x24c   : > { %v957_v40 = vpop.trf.xlu0 }
 0x24d   : > { %966 = vst.msk [vmem:[%s229_s30] sm:$0xf] %vm965_vm2, %v957_v40 }
 0x24e PF: > { %s16_s18 = sadd.s32 1, %s1182_s18  }
 0x24f   : > { %p13_p4 = scmp.ge.s32.totalorder %s16_s18, 4  }
 0x251   :  { %15 = sbr.rel (!%p13_p4) target bundleno = 1 (0x1), region = 78 }

// kernel: downscale_block_nchw.3
= control target key start
LH: loop header
LB: loop body
LE: loop exit
PB: predicated region body
PF: predicated region fallthrough
CT: control target
= control target key end

     0   :  { %s3232_s12 = smov 0   ;;  %s3992_s0 = inlined_call_operand.vmem [shape: bf16[2,16,16,4], index: 0, kind: input, shape index: {}]   ;;  %s3993_s1 = inlined_call_operand.vmem [shape: bf16[36,8], index: 1, kind: input, shape index: {}]   ;;  %s3994_s2 = inlined_call_operand.vmem [shape: bf16[2,64,8], index: 2, kind: output, shape index: {0}]   ;;  %s3995_s3 = inlined_call_operand.vmem [shape: f32[2,2,8], index: 3, kind: output, shape index: {1}]  }
   0x1 LB: > { %s3039_s13 = sadd.s32 4294967295, %s3200_s12   ;;  %p3043_p0 = scmp.ge.s32.totalorder %s3200_s12, 1  ;;  %s3200_s12 = sphi %s3232_s12, %s14_s12  }
   0x2   : > { %p140_p1 = scmp.lt.s32.totalorder %s3200_s12, 3 }
   0x4   : > { %p141_p2 = pnand %p3043_p0, %p140_p1 }
   0x5   : > { %vm2366_vm0 = vcmask (!%p141_p2), 1040384   ;;  %vm2367_vm1 = vsmask.f32 (!%p141_p2), 256  ;;  %vm2378_vm2 = vcmask (!%p141_p2), 1044480   ;;  %v3202_v0 = vmov (!%p141_p2), 0   ;;  %p168_p3 = scmp.lt.s32.totalorder (!%p141_p2), %s3039_s13, 1 }
   0x6   : > { %144 = sbr.rel (%p141_p2) target bundleno = 595 (0x253), region = 28  ;;  %v2297_v1 = vrot.slane (!%p141_p2), %v3202_v0, 7  ;;  %vm3241_vm3 = vmand (!%p141_p2), %vm2366_vm0, %vm2367_vm1  ;;  %vm2379_vm4 = vsmask.f32 (!%p141_p2), 4352  ;;  %v250_v3 = vlaneseq (!%p141_p2)  ;;  %v3203_v6 = vmov (!%p141_p2), 1966171168  }
   0x7   : > { %vm3245_vm5 = vmand (!%p141_p2), %vm2378_vm2, %vm2379_vm4  ;;  %v248_v7 = vunpack.c.l.s4 (!%p141_p2), %v3203_v6  ;;  %s3204_s18 = smov (!%p141_p2), 8   ;;  %s3205_s19 = smov (!%p141_p2), 4   ;;  %vm2168_vm6 = vcmask (!%p141_p2), 1041409   ;;  %vm2171_vm7 = vcmask (!%p141_p2), 1042434   ;;  %vm2174_vm8 = vcmask (!%p141_p2), 1043459  }
   0x8   : > { %v2369_v5 = vsel (!%p141_p2), %vm3241_vm3, 0, %v2297_v1  ;;  %v251_v8 = vshrl.u32 (!%p141_p2), %v250_v3, 7  ;;  %vm2177_vm9 = vcmask (!%p141_p2), 1044484   ;;  %vm2180_vm10 = vcmask (!%p141_p2), 1045509   ;;  %s3206_s20 = smov (!%p141_p2), 12   ;;  %s3207_s21 = smov (!%p141_p2), 24  }
   0x9   : > { %v3255_v9 = vsel (!%p141_p2), %vm3245_vm5, %v2369_v5, 0  ;;  %v249_v13 = vunpack.c.0.s8 (!%p141_p2), %v248_v7  ;;  %vm2183_vm11 = vcmask (!%p141_p2), 1046534   ;;  %vm2186_vm12 = vcmask (!%p141_p2), 1047559   ;;  %s3208_s22 = smov (!%p141_p2), 20   ;;  %s3209_s23 = smov (!%p141_p2), 16  }
   0xa   : > { %v2475_v10 = vrot.slane (!%p141_p2), %v3255_v9, 1  ;;  %v2396_v11 = vshrl.u32 (!%p141_p2), %v3255_v9, 16  ;;  %v2398_v12 = vshll.u32 (!%p141_p2), %v3255_v9, 16  ;;  %s3210_s24 = smov (!%p141_p2), 28   ;;  %s3211_s25 = smov (!%p141_p2), 32   ;;  %vm2788_vm13 = vcmask (!%p141_p2), 1041408  }
   0xb   : > { %v3271_v17 = vsub.s32 (!%p141_p2), %v249_v13, %v251_v8  ;;  %vm2604_vm14 = vcmask (!%p141_p2), 31744   ;;  %vm2621_vm15 = vcmask (!%p141_p2), 64512   ;;  %vm2638_vm1 = vcmask (!%p141_p2), 97280  }
   0xc   : > { %2483 = vrot.lane.b32.xlu0 (!%p141_p2), %v2475_v10, %s3204_s18  ;;  %v2400_v14 = vrot.slane (!%p141_p2), %v2398_v12, 1  ;;  %vm2655_vm2 = vcmask (!%p141_p2), 130048   ;;  %vm2689_vm4 = vcmask (!%p141_p2), 195584  }
   0xd   : > { %s4001_s13 = smov (!%p168_p3, %s3039_s13), 1 }
   0xe   : > { %s3134_s14 = sshll.u32 %s4001_s13, 7  ;;  %v3276_v21 = vor.u32 %v2400_v14, %v2396_v11  ;;  %s3135_s5 = sshll.u32 %s4001_s13, 5 }
   0xf   : > { %s3264_s17 = scalar_lea.vmem %s3992_s0, %s3134_s14  ;;  %s3950_s8 = scalar_lea.vmem %s3994_s2, %s3135_s5 }
  0x10   : > { %v187_v15 = vld [vmem:[%s3264_s17 + $0x10] sm:$0xf]  ;;  %v188_v16 = vld [vmem:[%s3264_s17 + $0x14] sm:$0xf]  ;;  %v189_v18 = vld [vmem:[%s3264_s17 + $0x18] sm:$0xf]  ;;  %2451 = vrot.lane.b32.xlu0 %v3276_v21, %s3205_s19 }
  0x11   : > { %v190_v19 = vld [vmem:[%s3264_s17 + $0x1c] sm:$0xf]  ;;  %v183_v20 = vld [vmem:[%s3264_s17] sm:$0xf]  ;;  %v217_v22 = vmax.bf16 %v189_v18, %v187_v15  ;;  %v184_v24 = vld [vmem:[%s3264_s17 + $0x4] sm:$0xf] }
  0x12   : > { %v218_v23 = vmax.bf16 %v190_v19, %v188_v16  ;;  %v185_v25 = vld [vmem:[%s3264_s17 + $0x8] sm:$0xf]  ;;  %v186_v26 = vld [vmem:[%s3264_s17 + $0xc] sm:$0xf]  ;;  %v3282_v29 = vld [vmem:[%s3264_s17 + $0x30] sm:$0xf] }
  0x13   : > { %v215_v27 = vmax.bf16 %v185_v25, %v183_v20  ;;  %v216_v28 = vmax.bf16 %v186_v26, %v184_v24  ;;  %v3285_v30 = vld [vmem:[%s3264_s17 + $0x34] sm:$0xf]  ;;  %v3288_v31 = vld [vmem:[%s3264_s17 + $0x38] sm:$0xf]  ;;  %v301_v32 = vrot.slane %v217_v22, %v3271_v17  ;;  %v3295_v34 = vld [vmem:[%s3264_s17 + $0x3c] sm:$0xf] }
  0x14   : > { %v325_v33 = vrot.slane %v218_v23, %v3271_v17  ;;  %v221_v37 = vmax.bf16 %v3288_v31, %v3282_v29  ;;  %v222_v38 = vmax.bf16 %v3295_v34, %v3285_v30  ;;  %s3048_s9 = sshll.u32 %s4001_s13, 1 }
  0x15   : > { %v253_v35 = vrot.slane %v215_v27, %v3271_v17  ;;  %v3299_v36 = vrot.slane %v216_v28, %v3271_v17  ;;  %v302_v39 = vcombine.high %v301_v32, %v301_v32  ;;  %v309_v40 = vrot.slane %v301_v32, %v3271_v17  ;;  %s181_s14 = scalar_lea.vmem %s3995_s3, %s3048_s9 }
  0x16   : > { %v326_v41 = vcombine.high %v325_v33, %v325_v33  ;;  %v333_v42 = vrot.slane %v325_v33, %v3271_v17 }
  0x17   : > { %v254_v43 = vcombine.high %v253_v35, %v253_v35  ;;  %v3308_v44 = vrot.slane %v253_v35, %v3271_v17  ;;  %v278_v45 = vcombine.high %v3299_v36, %v3299_v36  ;;  %v3314_v46 = vrot.slane %v3299_v36, %v3271_v17 }
  0x18   : > { %v316_v47 = vrot.slane %v302_v39, %v3271_v17  ;;  %v317_v48 = vcombine.high %v309_v40, %v309_v40  ;;  %v340_v49 = vrot.slane %v326_v41, %v3271_v17  ;;  %v341_v50 = vcombine.high %v333_v42, %v333_v42 }
  0x19   : > { %v736_v51 = vshrl.u32 %v309_v40, 16  ;;  %v756_v52 = vshrl.u32 %v333_v42, 16  ;;  %v3319_v53 = vrot.slane %v254_v43, %v3271_v17  ;;  %v3323_v54 = vcombine.high %v3308_v44, %v3308_v44 }
  0x1a   : > { %v318_v55 = vcombine.high %v316_v47, %v316_v47  ;;  %v342_v56 = vcombine.high %v340_v49, %v340_v49  ;;  %v741_v57 = vshrl.u32 %v316_v47, 16  ;;  %v746_v58 = vshrl.u32 %v317_v48, 16 }
  0x1b   : > { %v761_v59 = vshrl.u32 %v340_v49, 16  ;;  %v766_v60 = vshrl.u32 %v341_v50, 16  ;;  %v1087_v61 = vmax.bf16 %v736_v51, %v309_v40  ;;  %v1091_v62 = vmax.bf16 %v756_v52, %v333_v42 }
  0x1c   : > { %v751_v63 = vshrl.u32 %v318_v55, 16  ;;  %v771_v0 = vshrl.u32 %v342_v56, 16  ;;  %v1088_v1 = vmax.bf16 %v741_v57, %v316_v47  ;;  %v1089_v3 = vmax.bf16 %v746_v58, %v317_v48 }
  0x1d   : > { %v1092_v5 = vmax.bf16 %v761_v59, %v340_v49  ;;  %v1093_v6 = vmax.bf16 %v766_v60, %v341_v50  ;;  %v1325_v7 = vrot.slane %v1087_v61, %v3271_v17  ;;  %v1381_v8 = vrot.slane %v1091_v62, %v3271_v17 }
  0x1e   : > { %v1090_v11 = vmax.bf16 %v751_v63, %v318_v55  ;;  %v1094_v12 = vmax.bf16 %v771_v0, %v342_v56  ;;  %v1339_v13 = vrot.slane %v1088_v1, %v3271_v17  ;;  %v1353_v14 = vrot.slane %v1089_v3, %v3271_v17 }
  0x1f   : > { %v1332_v15 = vrot.slane %v1325_v7, %v3271_v17  ;;  %v1388_v16 = vrot.slane %v1381_v8, %v3271_v17  ;;  %v1395_v18 = vrot.slane %v1092_v5, %v3271_v17  ;;  %v1409_v19 = vrot.slane %v1093_v6, %v3271_v17 }
  0x20   : > { %v1346_v20 = vrot.slane %v1339_v13, %v3271_v17  ;;  %v1360_v22 = vrot.slane %v1353_v14, %v3271_v17  ;;  %v1367_v23 = vrot.slane %v1090_v11, %v3271_v17  ;;  %v1423_v24 = vrot.slane %v1094_v12, %v3271_v17 }
  0x21   : > { %v1402_v25 = vrot.slane %v1395_v18, %v3271_v17  ;;  %v1416_v26 = vrot.slane %v1409_v19, %v3271_v17  ;;  %v2111_v27 = vunpack.c.l.b16 %v1332_v15  ;;  %v2115_v28 = vunpack.c.l.b16 %v1388_v16 }
  0x22   : > { %v1374_v32 = vrot.slane %v1367_v23, %v3271_v17  ;;  %v1430_v33 = vrot.slane %v1423_v24, %v3271_v17  ;;  %v2112_v35 = vunpack.c.l.b16 %v1346_v20  ;;  %v2113_v39 = vunpack.c.l.b16 %v1360_v22 }
  0x23   : > { %v2116_v40 = vunpack.c.l.b16 %v1402_v25  ;;  %v2117_v41 = vunpack.c.l.b16 %v1416_v26  ;;  %v2194_v42 = vrot.slane %v2115_v28, 4  ;;  %v270_v43 = vcombine.high %v3319_v53, %v3319_v53 }
  0x24   : > { %v2114_v47 = vunpack.c.l.b16 %v1374_v32  ;;  %v2118_v48 = vunpack.c.l.b16 %v1430_v33  ;;  %v2188_v49 = vrot.slane %v2112_v35, 7  ;;  %v2190_v50 = vrot.slane %v2113_v39, 6 }
  0x25   : > { %v2196_v51 = vrot.slane %v2116_v40, 3  ;;  %v2198_v52 = vrot.slane %v2117_v41, 2  ;;  %v292_v55 = vrot.slane %v278_v45, %v3271_v17  ;;  %v293_v56 = vcombine.high %v3314_v46, %v3314_v46 }
  0x26   : > { %v2189_v57 = vsel %vm2168_vm6, %v2188_v49, %v2111_v27  ;;  %v2192_v58 = vrot.slane %v2114_v47, 5  ;;  %v2200_v59 = vrot.slane %v2118_v48, 1  ;;  %v696_v60 = vshrl.u32 %v3308_v44, 16 }
  0x27   : > { %v2191_v61 = vsel %vm2171_vm7, %v2190_v50, %v2189_v57  ;;  %v294_v62 = vcombine.high %v292_v55, %v292_v55  ;;  %v701_v63 = vshrl.u32 %v3319_v53, 16  ;;  %v706_v0 = vshrl.u32 %v3323_v54, 16 }
  0x28   : > { %v2193_v1 = vsel %vm2174_vm8, %v2192_v58, %v2191_v61  ;;  %v711_v36 = vshrl.u32 %v270_v43, 16  ;;  %v716_v45 = vshrl.u32 %v3314_v46, 16  ;;  %v721_v3 = vshrl.u32 %v292_v55, 16  ;;  %v3381_v61 = vld [vmem:[%s3264_s17 + $0x20] sm:$0xf] }
  0x29   : > { %v2195_v5 = vsel %vm2177_vm9, %v2194_v42, %v2193_v1  ;;  %v726_v6 = vshrl.u32 %v293_v56, 16  ;;  %v731_v7 = vshrl.u32 %v294_v62, 16  ;;  %v1079_v8 = vmax.bf16 %v696_v60, %v3308_v44 }
  0x2a   : > { %v2197_v11 = vsel %vm2180_vm10, %v2196_v51, %v2195_v5  ;;  %v1080_v12 = vmax.bf16 %v701_v63, %v3319_v53  ;;  %v1081_v13 = vmax.bf16 %v706_v0, %v3323_v54  ;;  %v1082_v14 = vmax.bf16 %v711_v36, %v270_v43  ;;  %v3384_v36 = vld [vmem:[%s3264_s17 + $0x28] sm:$0xf] }
  0x2b   : > { %v2199_v15 = vsel %vm2183_vm11, %v2198_v52, %v2197_v11  ;;  %v1083_v16 = vmax.bf16 %v716_v45, %v3314_v46  ;;  %v1084_v18 = vmax.bf16 %v721_v3, %v292_v55  ;;  %v1085_v19 = vmax.bf16 %v726_v6, %v293_v56 }
  0x2c   : > { %v2201_v20 = vsel %vm2186_vm12, %v2200_v59, %v2199_v15  ;;  %v1086_v22 = vmax.bf16 %v731_v7, %v294_v62  ;;  %v1213_v23 = vrot.slane %v1079_v8, %v3271_v17  ;;  %v1227_v44 = vrot.slane %v1080_v12, %v3271_v17  ;;  %v3394_v7 = vld [vmem:[%s3264_s17 + $0x24] sm:$0xf]  ;;  %v3397_v8 = vld [vmem:[%s3264_s17 + $0x2c] sm:$0xf] }
  0x2d   : > { %v2287_v24 = vpack.c.b16 %v2201_v20, %v2201_v20  ;;  %v1241_v25 = vrot.slane %v1081_v13, %v3271_v17  ;;  %v1255_v53 = vrot.slane %v1082_v14, %v3271_v17  ;;  %v1269_v54 = vrot.slane %v1083_v16, %v3271_v17 }
  0x2e   : > { %v1220_v26 = vrot.slane %v1213_v23, %v3271_v17  ;;  %v1234_v46 = vrot.slane %v1227_v44, %v3271_v17  ;;  %v1283_v27 = vrot.slane %v1084_v18, %v3271_v17  ;;  %v1297_v28 = vrot.slane %v1085_v19, %v3271_v17 }
  0x2f   : > { %v2309_v32 = vshrl.u32 %v2287_v24, 16  ;;  %v2312_v33 = vshll.u32 %v2287_v24, 16  ;;  %v1248_v35 = vrot.slane %v1241_v25, %v3271_v17  ;;  %v1262_v39 = vrot.slane %v1255_v53, %v3271_v17 }
  0x30   : > { %v1276_v40 = vrot.slane %v1269_v54, %v3271_v17  ;;  %v1290_v41 = vrot.slane %v1283_v27, %v3271_v17  ;;  %v1304_v42 = vrot.slane %v1297_v28, %v3271_v17  ;;  %v1311_v43 = vrot.slane %v1086_v22, %v3271_v17 }
  0x31   : > { %v2311_v47 = vrot.slane %v2309_v32, 7  ;;  %v2103_v48 = vunpack.c.l.b16 %v1220_v26  ;;  %v2104_v49 = vunpack.c.l.b16 %v1234_v46  ;;  %v2105_v50 = vunpack.c.l.b16 %v1248_v35 }
  0x32   : > { %v1318_v51 = vrot.slane %v1311_v43, %v3271_v17  ;;  %v2106_v52 = vunpack.c.l.b16 %v1262_v39  ;;  %v2107_v55 = vunpack.c.l.b16 %v1276_v40  ;;  %v2108_v56 = vunpack.c.l.b16 %v1290_v41 }
  0x33   : > { %v2314_v57 = vor.u32 %v2312_v33, %v2311_v47  ;;  %v2109_v58 = vunpack.c.l.b16 %v1304_v42  ;;  %v2167_v59 = vrot.slane %v2104_v49, 7  ;;  %v2170_v60 = vrot.slane %v2105_v50, 6 }
  0x34   : > { %v2110_v62 = vunpack.c.l.b16 %v1318_v51  ;;  %v2173_v63 = vrot.slane %v2106_v52, 5  ;;  %v2176_v0 = vrot.slane %v2107_v55, 4  ;;  %v2179_v1 = vrot.slane %v2108_v56, 3 }
  0x35   : > { %v2371_v45 = vsel %vm3241_vm3, 0, %v2314_v57  ;;  %v2169_v3 = vsel %vm2168_vm6, %v2167_v59, %v2103_v48  ;;  %v2182_v5 = vrot.slane %v2109_v58, 2  ;;  %v397_v6 = vrot.slane %v221_v37, %v3271_v17 }
  0x36   : > { %v3401_v11 = vsel %vm3245_vm5, %v2371_v45, 0  ;;  %v2172_v12 = vsel %vm2171_vm7, %v2170_v60, %v2169_v3  ;;  %v2185_v13 = vrot.slane %v2110_v62, 1  ;;  %v421_v14 = vrot.slane %v222_v38, %v3271_v17 }
  0x37   : > { %2502 = vrot.lane.b32.xlu1 %v3401_v11, %s3206_s20  ;;  %v2175_v29 = vsel %vm2174_vm8, %v2173_v63, %v2172_v12  ;;  %v398_v31 = vcombine.high %v397_v6, %v397_v6  ;;  %v405_v37 = vrot.slane %v397_v6, %v3271_v17  ;;  %v219_v15 = vmax.bf16 %v3384_v36, %v3381_v61 }
  0x38   : > { %v2178_v16 = vsel %vm2177_vm9, %v2176_v0, %v2175_v29  ;;  %v422_v18 = vcombine.high %v421_v14, %v421_v14  ;;  %v429_v19 = vrot.slane %v421_v14, %v3271_v17  ;;  %v220_v30 = vmax.bf16 %v3397_v8, %v3394_v7 }
  0x39   : > { %v2181_v34 = vsel %vm2180_vm10, %v2179_v1, %v2178_v16  ;;  %v412_v38 = vrot.slane %v398_v31, %v3271_v17  ;;  %v413_v20 = vcombine.high %v405_v37, %v405_v37  ;;  %v816_v22 = vshrl.u32 %v405_v37, 16 }
  0x3a   : > { %v2184_v23 = vsel %vm2183_vm11, %v2182_v5, %v2181_v34  ;;  %v436_v44 = vrot.slane %v422_v18, %v3271_v17  ;;  %v437_v24 = vcombine.high %v429_v19, %v429_v19  ;;  %v836_v25 = vshrl.u32 %v429_v19, 16 }
  0x3b   : > { %v2187_v53 = vsel %vm2186_vm12, %v2185_v13, %v2184_v23  ;;  %v414_v54 = vcombine.high %v412_v38, %v412_v38  ;;  %v821_v26 = vshrl.u32 %v412_v38, 16  ;;  %v826_v46 = vshrl.u32 %v413_v20, 16 }
  0x3c   : > { %v2286_v27 = vpack.c.b16 %v2187_v53, %v2187_v53  ;;  %v438_v28 = vcombine.high %v436_v44, %v436_v44  ;;  %v841_v32 = vshrl.u32 %v436_v44, 16  ;;  %v846_v33 = vshrl.u32 %v437_v24, 16 }
  0x3d   : > { %v831_v35 = vshrl.u32 %v414_v54, 16  ;;  %v1103_v39 = vmax.bf16 %v816_v22, %v405_v37  ;;  %v1104_v40 = vmax.bf16 %v821_v26, %v412_v38  ;;  %v1105_v41 = vmax.bf16 %v826_v46, %v413_v20  ;;  %v201_v46 = vld [vmem:[%s3264_s17 + $0x48] sm:$0xf] }
  0x3e   : > { %v2302_v42 = vshrl.u32 %v2286_v27, 16  ;;  %v2305_v43 = vshll.u32 %v2286_v27, 16  ;;  %v851_v47 = vshrl.u32 %v438_v28, 16  ;;  %v1107_v48 = vmax.bf16 %v836_v25, %v429_v19  ;;  %v3457_v27 = vld [vmem:[%s3264_s17 + $0x4c] sm:$0xf] }
  0x3f   : > { %v1106_v49 = vmax.bf16 %v831_v35, %v414_v54  ;;  %v1108_v50 = vmax.bf16 %v841_v32, %v436_v44  ;;  %v1109_v51 = vmax.bf16 %v846_v33, %v437_v24  ;;  %v1549_v52 = vrot.slane %v1103_v39, %v3271_v17  ;;  %v199_v44 = vld [vmem:[%s3264_s17 + $0x40] sm:$0xf]  ;;  %v3449_v24 = vld [vmem:[%s3264_s17 + $0x44] sm:$0xf] }
  0x40   : > { %v2304_v55 = vrot.slane %v2302_v42, 7  ;;  %v1110_v56 = vmax.bf16 %v851_v47, %v438_v28  ;;  %v1563_v57 = vrot.slane %v1104_v40, %v3271_v17  ;;  %v1577_v58 = vrot.slane %v1105_v41, %v3271_v17 }
  0x41   : > { %v1556_v59 = vrot.slane %v1549_v52, %v3271_v17  ;;  %v1591_v60 = vrot.slane %v1106_v49, %v3271_v17  ;;  %v1605_v62 = vrot.slane %v1107_v48, %v3271_v17  ;;  %v1619_v63 = vrot.slane %v1108_v50, %v3271_v17 }
  0x42   : > { %v2307_v0 = vor.u32 %v2305_v43, %v2304_v55  ;;  %v1570_v1 = vrot.slane %v1563_v57, %v3271_v17  ;;  %v1584_v45 = vrot.slane %v1577_v58, %v3271_v17  ;;  %v1633_v3 = vrot.slane %v1109_v51, %v3271_v17 }
  0x43   : > { %v1598_v5 = vrot.slane %v1591_v60, %v3271_v17  ;;  %v1612_v6 = vrot.slane %v1605_v62, %v3271_v17  ;;  %v1626_v12 = vrot.slane %v1619_v63, %v3271_v17  ;;  %v1647_v13 = vrot.slane %v1110_v56, %v3271_v17 }
  0x44   : > { %v2370_v14 = vsel %vm3241_vm3, 0, %v2307_v0  ;;  %v1640_v29 = vrot.slane %v1633_v3, %v3271_v17  ;;  %v2127_v31 = vunpack.c.l.b16 %v1556_v59  ;;  %v2128_v37 = vunpack.c.l.b16 %v1570_v1 }
  0x45   : > { %v3442_v16 = vsel %vm3245_vm5, %v2370_v14, 0  ;;  %v1654_v18 = vrot.slane %v1647_v13, %v3271_v17  ;;  %v2129_v19 = vunpack.c.l.b16 %v1584_v45  ;;  %v2130_v34 = vunpack.c.l.b16 %v1598_v5 }
  0x46   : > { %2500 = vrot.lane.b32.xlu0 %v3442_v16, %s3206_s20  ;;  %v2131_v38 = vunpack.c.l.b16 %v1612_v6  ;;  %v2132_v20 = vunpack.c.l.b16 %v1626_v12  ;;  %v2133_v22 = vunpack.c.l.b16 %v1640_v29  ;;  %v2216_v23 = vrot.slane %v2128_v37, 7 }
  0x47   : > { %v2134_v25 = vunpack.c.l.b16 %v1654_v18  ;;  %v2218_v53 = vrot.slane %v2129_v19, 6  ;;  %v2220_v54 = vrot.slane %v2130_v34, 5  ;;  %v349_v26 = vrot.slane %v219_v15, %v3271_v17 }
  0x48   : > { %v2217_v28 = vsel %vm2168_vm6, %v2216_v23, %v2127_v31  ;;  %v2222_v32 = vrot.slane %v2131_v38, 4  ;;  %v2224_v33 = vrot.slane %v2132_v20, 3  ;;  %v2226_v35 = vrot.slane %v2133_v22, 2 }
  0x49   : > { %v2219_v39 = vsel %vm2171_vm7, %v2218_v53, %v2217_v28  ;;  %v2228_v40 = vrot.slane %v2134_v25, 1  ;;  %v350_v41 = vcombine.high %v349_v26, %v349_v26  ;;  %v357_v42 = vrot.slane %v349_v26, %v3271_v17 }
  0x4a   : > { %v2221_v43 = vsel %vm2174_vm8, %v2220_v54, %v2219_v39  ;;  %v373_v61 = vrot.slane %v220_v30, %v3271_v17  ;;  %v223_v36 = vmax.bf16 %v201_v46, %v199_v44  ;;  %v224_v15 = vmax.bf16 %v3457_v27, %v3449_v24 }
  0x4b   : > { %v2223_v47 = vsel %vm2177_vm9, %v2222_v32, %v2221_v43  ;;  %v364_v48 = vrot.slane %v350_v41, %v3271_v17  ;;  %v365_v49 = vcombine.high %v357_v42, %v357_v42  ;;  %v776_v50 = vshrl.u32 %v357_v42, 16 }
  0x4c   : > { %v2225_v51 = vsel %vm2180_vm10, %v2224_v33, %v2223_v47  ;;  %v374_v52 = vcombine.high %v373_v61, %v373_v61  ;;  %v381_v55 = vrot.slane %v373_v61, %v3271_v17  ;;  %v3474_v56 = vrot.slane %v223_v36, %v3271_v17 }
  0x4d   : > { %v2227_v7 = vsel %vm2183_vm11, %v2226_v35, %v2225_v51  ;;  %v366_v8 = vcombine.high %v364_v48, %v364_v48  ;;  %v781_v30 = vshrl.u32 %v364_v48, 16  ;;  %v786_v57 = vshrl.u32 %v365_v49, 16 }
  0x4e   : > { %v2229_v58 = vsel %vm2186_vm12, %v2228_v40, %v2227_v7  ;;  %v388_v59 = vrot.slane %v374_v52, %v3271_v17  ;;  %v389_v60 = vcombine.high %v381_v55, %v381_v55  ;;  %v796_v62 = vshrl.u32 %v381_v55, 16 }
  0x4f   : > { %v2289_v63 = vpack.c.b16 %v2229_v58, %v2229_v58  ;;  %v791_v0 = vshrl.u32 %v366_v8, 16  ;;  %v1095_v1 = vmax.bf16 %v776_v50, %v357_v42  ;;  %v1096_v45 = vmax.bf16 %v781_v30, %v364_v48 }
  0x50   : > { %v390_v3 = vcombine.high %v388_v59, %v388_v59  ;;  %v801_v5 = vshrl.u32 %v388_v59, 16  ;;  %v806_v6 = vshrl.u32 %v389_v60, 16  ;;  %v1097_v12 = vmax.bf16 %v786_v57, %v365_v49 }
  0x51   : > { %v2323_v13 = vshrl.u32 %v2289_v63, 16  ;;  %v2326_v14 = vshll.u32 %v2289_v63, 16  ;;  %v1098_v29 = vmax.bf16 %v791_v0, %v366_v8  ;;  %v1099_v31 = vmax.bf16 %v796_v62, %v381_v55 }
  0x52   : > { %v811_v37 = vshrl.u32 %v390_v3, 16  ;;  %v1100_v18 = vmax.bf16 %v801_v5, %v388_v59  ;;  %v1101_v19 = vmax.bf16 %v806_v6, %v389_v60  ;;  %v1437_v34 = vrot.slane %v1095_v1, %v3271_v17 }
  0x53   : > { %v2325_v38 = vrot.slane %v2323_v13, 7  ;;  %v1451_v20 = vrot.slane %v1096_v45, %v3271_v17  ;;  %v1465_v22 = vrot.slane %v1097_v12, %v3271_v17  ;;  %v1479_v23 = vrot.slane %v1098_v29, %v3271_v17 }
  0x54   : > { %v1102_v44 = vmax.bf16 %v811_v37, %v390_v3  ;;  %v1444_v25 = vrot.slane %v1437_v34, %v3271_v17  ;;  %v1493_v53 = vrot.slane %v1099_v31, %v3271_v17  ;;  %v1507_v54 = vrot.slane %v1100_v18, %v3271_v17 }
  0x55   : > { %v2328_v26 = vor.u32 %v2326_v14, %v2325_v38  ;;  %v1458_v46 = vrot.slane %v1451_v20, %v3271_v17  ;;  %v1472_v28 = vrot.slane %v1465_v22, %v3271_v17  ;;  %v1486_v32 = vrot.slane %v1479_v23, %v3271_v17 }
  0x56   : > { %v1500_v33 = vrot.slane %v1493_v53, %v3271_v17  ;;  %v1514_v35 = vrot.slane %v1507_v54, %v3271_v17  ;;  %v1521_v39 = vrot.slane %v1101_v19, %v3271_v17  ;;  %v1535_v40 = vrot.slane %v1102_v44, %v3271_v17 }
  0x57   : > { %v2373_v41 = vsel %vm3241_vm3, 0, %v2328_v26  ;;  %v2119_v42 = vunpack.c.l.b16 %v1444_v25  ;;  %v2120_v43 = vunpack.c.l.b16 %v1458_v46  ;;  %v2121_v61 = vunpack.c.l.b16 %v1472_v28 }
  0x58   : > { %v3497_v36 = vsel %vm3245_vm5, %v2373_v41, 0  ;;  %v1528_v47 = vrot.slane %v1521_v39, %v3271_v17  ;;  %v1542_v48 = vrot.slane %v1535_v40, %v3271_v17  ;;  %v2122_v49 = vunpack.c.l.b16 %v1486_v32 }
  0x59   : > { %2506 = vrot.lane.b32.xlu1 %v3497_v36, %s3206_s20  ;;  %v2123_v50 = vunpack.c.l.b16 %v1500_v33  ;;  %v2124_v51 = vunpack.c.l.b16 %v1514_v35  ;;  %v2202_v52 = vrot.slane %v2120_v43, 7  ;;  %v2204_v55 = vrot.slane %v2121_v61, 6 }
  0x5a   : > { %v2125_v7 = vunpack.c.l.b16 %v1528_v47  ;;  %v2126_v8 = vunpack.c.l.b16 %v1542_v48  ;;  %v2206_v30 = vrot.slane %v2122_v49, 5  ;;  %v446_v57 = vcombine.high %v3474_v56, %v3474_v56 }
  0x5b   : > { %v2203_v58 = vsel %vm2168_vm6, %v2202_v52, %v2119_v42  ;;  %v2208_v59 = vrot.slane %v2123_v50, 4  ;;  %v2210_v60 = vrot.slane %v2124_v51, 3  ;;  %v453_v62 = vrot.slane %v3474_v56, %v3271_v17 }
  0x5c   : > { %v2205_v63 = vsel %vm2171_vm7, %v2204_v55, %v2203_v58  ;;  %v2212_v0 = vrot.slane %v2125_v7, 2  ;;  %v2214_v1 = vrot.slane %v2126_v8, 1  ;;  %v460_v45 = vrot.slane %v446_v57, %v3271_v17 }
  0x5d   : > { %v2207_v3 = vsel %vm2174_vm8, %v2206_v30, %v2205_v63  ;;  %v461_v5 = vcombine.high %v453_v62, %v453_v62  ;;  %v469_v6 = vrot.slane %v224_v15, %v3271_v17  ;;  %v856_v12 = vshrl.u32 %v453_v62, 16 }
  0x5e   : > { %v2209_v13 = vsel %vm2177_vm9, %v2208_v59, %v2207_v3  ;;  %v462_v14 = vcombine.high %v460_v45, %v460_v45  ;;  %v861_v29 = vshrl.u32 %v460_v45, 16 }
  0x5f   : > { %v2211_v56 = vsel %vm2180_vm10, %v2210_v60, %v2209_v13  ;;  %v470_v31 = vcombine.high %v469_v6, %v469_v6  ;;  %v477_v37 = vrot.slane %v469_v6, %v3271_v17  ;;  %v866_v18 = vshrl.u32 %v461_v5, 16 }
  0x60   : > { %v2213_v19 = vsel %vm2183_vm11, %v2212_v0, %v2211_v56  ;;  %v871_v34 = vshrl.u32 %v462_v14, 16  ;;  %v1111_v38 = vmax.bf16 %v856_v12, %v453_v62  ;;  %v1112_v20 = vmax.bf16 %v861_v29, %v460_v45 }
  0x61   : > { %v2215_v22 = vsel %vm2186_vm12, %v2214_v1, %v2213_v19  ;;  %v484_v24 = vrot.slane %v470_v31, %v3271_v17  ;;  %v485_v27 = vcombine.high %v477_v37, %v477_v37  ;;  %v876_v15 = vshrl.u32 %v477_v37, 16  ;;  %v203_v19 = vld [vmem:[%s3264_s17 + $0x50] sm:$0xf] }
  0x62   : > { %v2288_v23 = vpack.c.b16 %v2215_v22, %v2215_v22  ;;  %v1113_v44 = vmax.bf16 %v866_v18, %v461_v5  ;;  %v1114_v25 = vmax.bf16 %v871_v34, %v462_v14  ;;  %v1661_v53 = vrot.slane %v1111_v38, %v3271_v17 }
  0x63   : > { %v486_v54 = vcombine.high %v484_v24, %v484_v24  ;;  %v881_v26 = vshrl.u32 %v484_v24, 16  ;;  %v886_v46 = vshrl.u32 %v485_v27, 16  ;;  %v1115_v28 = vmax.bf16 %v876_v15, %v477_v37 }
  0x64   : > { %v2316_v32 = vshrl.u32 %v2288_v23, 16  ;;  %v2319_v33 = vshll.u32 %v2288_v23, 16  ;;  %v1668_v35 = vrot.slane %v1661_v53, %v3271_v17  ;;  %v1675_v39 = vrot.slane %v1112_v20, %v3271_v17 }
  0x65   : > { %v891_v40 = vshrl.u32 %v486_v54, 16  ;;  %v1116_v41 = vmax.bf16 %v881_v26, %v484_v24  ;;  %v1117_v42 = vmax.bf16 %v886_v46, %v485_v27  ;;  %v1689_v43 = vrot.slane %v1113_v44, %v3271_v17  ;;  %v204_v24 = vld [vmem:[%s3264_s17 + $0x54] sm:$0xf] }
  0x66   : > { %v2318_v61 = vrot.slane %v2316_v32, 7  ;;  %v1682_v47 = vrot.slane %v1675_v39, %v3271_v17  ;;  %v1703_v48 = vrot.slane %v1114_v25, %v3271_v17  ;;  %v1717_v49 = vrot.slane %v1115_v28, %v3271_v17  ;;  %v205_v25 = vld [vmem:[%s3264_s17 + $0x58] sm:$0xf]  ;;  %v206_v28 = vld [vmem:[%s3264_s17 + $0x5c] sm:$0xf] }
  0x67   : > { %v1118_v50 = vmax.bf16 %v891_v40, %v486_v54  ;;  %v1696_v51 = vrot.slane %v1689_v43, %v3271_v17  ;;  %v1731_v52 = vrot.slane %v1116_v41, %v3271_v17  ;;  %v1745_v55 = vrot.slane %v1117_v42, %v3271_v17 }
  0x68   : > { %v2321_v7 = vor.u32 %v2319_v33, %v2318_v61  ;;  %v1710_v8 = vrot.slane %v1703_v48, %v3271_v17  ;;  %v1724_v30 = vrot.slane %v1717_v49, %v3271_v17  ;;  %v2135_v57 = vunpack.c.l.b16 %v1668_v35 }
  0x69   : > { %v1738_v58 = vrot.slane %v1731_v52, %v3271_v17  ;;  %v1752_v59 = vrot.slane %v1745_v55, %v3271_v17  ;;  %v1759_v60 = vrot.slane %v1118_v50, %v3271_v17  ;;  %v2136_v62 = vunpack.c.l.b16 %v1682_v47  ;;  %v207_v50 = vld [vmem:[%s3264_s17 + $0x60] sm:$0xf] }
  0x6a   : > { %v2372_v63 = vsel %vm3241_vm3, 0, %v2321_v7  ;;  %v2137_v0 = vunpack.c.l.b16 %v1696_v51  ;;  %v2138_v1 = vunpack.c.l.b16 %v1710_v8  ;;  %v2139_v45 = vunpack.c.l.b16 %v1724_v30  ;;  %v209_v51 = vld [vmem:[%s3264_s17 + $0x68] sm:$0xf] }
  0x6b   : > { %v3540_v3 = vsel %vm3245_vm5, %v2372_v63, 0  ;;  %v1766_v5 = vrot.slane %v1759_v60, %v3271_v17  ;;  %v2140_v6 = vunpack.c.l.b16 %v1738_v58  ;;  %v2141_v12 = vunpack.c.l.b16 %v1752_v59  ;;  %v3591_v60 = vld [vmem:[%s3264_s17 + $0x64] sm:$0xf] }
  0x6c   : > { %2504 = vrot.lane.b32.xlu0 %v3540_v3, %s3206_s20  ;;  %2558 = vrot.lane.b32.xlu1 %v3540_v3, %s3207_s21  ;;  %v2230_v13 = vrot.slane %v2136_v62, 7  ;;  %v2232_v14 = vrot.slane %v2137_v0, 6  ;;  %v2234_v29 = vrot.slane %v2138_v1, 5  ;;  %v2236_v31 = vrot.slane %v2139_v45, 4  ;;  %v3594_v62 = vld [vmem:[%s3264_s17 + $0x6c] sm:$0xf] }
  0x6d   : > { %v2142_v56 = vunpack.c.l.b16 %v1766_v5  ;;  %v2238_v37 = vrot.slane %v2140_v6, 3  ;;  %v3548_v18 = vrot.slane %v3401_v11, 1  ;;  %v2240_v38 = vrot.slane %v2141_v12, 2 }
  0x6e   : > { %v2231_v34 = vsel %vm2168_vm6, %v2230_v13, %v2135_v57  ;;  %v2476_v20 = vrot.slane %v3442_v16, 1  ;;  %v2403_v22 = vshrl.u32 %v3442_v16, 16  ;;  %v2405_v23 = vshll.u32 %v3442_v16, 16 }
  0x6f   : > { %v2233_v27 = vsel %vm2171_vm7, %v2232_v14, %v2231_v34  ;;  %v2242_v15 = vrot.slane %v2142_v56, 1  ;;  %v2410_v44 = vshrl.u32 %v3401_v11, 16  ;;  %v2412_v54 = vshll.u32 %v3401_v11, 16 }
  0x70   : > { %2556 = vrot.lane.b32.xlu0 %v3401_v11, %s3207_s21  ;;  %v2235_v53 = vsel %vm2174_vm8, %v2234_v29, %v2233_v27  ;;  %v2417_v26 = vshrl.u32 %v3540_v3, 16  ;;  %v2419_v46 = vshll.u32 %v3540_v3, 16  ;;  %v2407_v33 = vrot.slane %v2405_v23, 1 }
  0x71   : > { %v2237_v32 = vsel %vm2177_vm9, %v2236_v31, %v2235_v53  ;;  %v2424_v35 = vshrl.u32 %v3497_v36, 16  ;;  %v2426_v39 = vshll.u32 %v3497_v36, 16  ;;  %v2414_v41 = vrot.slane %v2412_v54, 1 }
  0x72   : > { %v2239_v40 = vsel %vm2180_vm10, %v2238_v37, %v2237_v32  ;;  %v2421_v42 = vrot.slane %v2419_v46, 1  ;;  %v225_v43 = vmax.bf16 %v205_v25, %v203_v19  ;;  %v3572_v47 = vrot.slane %v3540_v3, 1  ;;  %v3610_v32 = vld [vmem:[%s3264_s17 + $0x70] sm:$0xf] }
  0x73   : > { %v2241_v61 = vsel %vm2183_vm11, %v2240_v38, %v2239_v40  ;;  %v2428_v48 = vrot.slane %v2426_v39, 1  ;;  %v226_v49 = vmax.bf16 %v206_v28, %v204_v24  ;;  %v3580_v55 = vrot.slane %v3497_v36, 1 }
  0x74   : > { %v2243_v52 = vsel %vm2186_vm12, %v2242_v15, %v2241_v61  ;;  %2560 = vrot.lane.b32.xlu0 %v3497_v36, %s3207_s21  ;;  %v3582_v7 = vor.u32 %v2407_v33, %v2403_v22  ;;  %v493_v8 = vrot.slane %v225_v43, %v3271_v17  ;;  %v3585_v57 = vor.u32 %v2414_v41, %v2410_v44  ;;  %v213_v33 = vld [vmem:[%s3264_s17 + $0x78] sm:$0xf] }
  0x75   : > { %v2290_v30 = vpack.c.b16 %v2243_v52, %v2243_v52  ;;  %v3587_v58 = vor.u32 %v2421_v42, %v2417_v26  ;;  %v517_v59 = vrot.slane %v226_v49, %v3271_v17  ;;  %v3596_v63 = vor.u32 %v2428_v48, %v2424_v35 }
  0x76   : > { %v494_v0 = vcombine.high %v493_v8, %v493_v8  ;;  %v501_v1 = vrot.slane %v493_v8, %v3271_v17  ;;  %v227_v45 = vmax.bf16 %v209_v51, %v207_v50  ;;  %v228_v31 = vmax.bf16 %v3594_v62, %v3591_v60 }
  0x77   : > { %v2330_v5 = vshrl.u32 %v2290_v30, 16  ;;  %v2333_v6 = vshll.u32 %v2290_v30, 16  ;;  %v518_v12 = vcombine.high %v517_v59, %v517_v59  ;;  %v525_v13 = vrot.slane %v517_v59, %v3271_v17 }
  0x78   : > { %2487 = vrot.lane.b32.xlu0 %v3548_v18, %s3204_s18  ;;  %v508_v14 = vrot.slane %v494_v0, %v3271_v17  ;;  %v509_v29 = vcombine.high %v501_v1, %v501_v1  ;;  %v896_v56 = vshrl.u32 %v501_v1, 16  ;;  %v541_v51 = vrot.slane %v227_v45, %v3271_v17 }
  0x79   : > { %v2332_v37 = vrot.slane %v2330_v5, 7  ;;  %v532_v19 = vrot.slane %v518_v12, %v3271_v17  ;;  %v533_v34 = vcombine.high %v525_v13, %v525_v13  ;;  %v916_v38 = vshrl.u32 %v525_v13, 16 }
  0x7a   : > { %v510_v22 = vcombine.high %v508_v14, %v508_v14  ;;  %v901_v24 = vshrl.u32 %v508_v14, 16  ;;  %v906_v27 = vshrl.u32 %v509_v29, 16  ;;  %v1119_v15 = vmax.bf16 %v896_v56, %v501_v1 }
  0x7b   : > { %v2335_v23 = vor.u32 %v2333_v6, %v2332_v37  ;;  %v534_v44 = vcombine.high %v532_v19, %v532_v19  ;;  %v921_v25 = vshrl.u32 %v532_v19, 16  ;;  %v926_v53 = vshrl.u32 %v533_v34, 16 }
  0x7c   : > { %2540 = vrot.lane.b32.xlu0 %v2476_v20, %s3208_s22  ;;  %v911_v54 = vshrl.u32 %v510_v22, 16  ;;  %v1120_v26 = vmax.bf16 %v901_v24, %v508_v14  ;;  %v1121_v46 = vmax.bf16 %v906_v27, %v509_v29  ;;  %v1123_v28 = vmax.bf16 %v916_v38, %v525_v13 }
  0x7d   : > { %v2374_v35 = vsel %vm3241_vm3, 0, %v2335_v23  ;;  %v931_v39 = vshrl.u32 %v534_v44, 16  ;;  %v1124_v40 = vmax.bf16 %v921_v25, %v532_v19  ;;  %v1125_v41 = vmax.bf16 %v926_v53, %v533_v34  ;;  %v3651_v25 = vld [vmem:[%s3264_s17 + $0x74] sm:$0xf] }
  0x7e   : > { %v3617_v42 = vsel %vm3245_vm5, %v2374_v35, 0  ;;  %v1122_v43 = vmax.bf16 %v911_v54, %v510_v22  ;;  %v1773_v61 = vrot.slane %v1119_v15, %v3271_v17  ;;  %v1787_v48 = vrot.slane %v1120_v26, %v3271_v17  ;;  %v2484_v4 = vpop.permute.xlu0 %2483 }
  0x7f   : > { %2562 = vrot.lane.b32.xlu1 %v3617_v42, %s3207_s21  ;;  %v1126_v49 = vmax.bf16 %v931_v39, %v534_v44  ;;  %v1801_v50 = vrot.slane %v1121_v46, %v3271_v17  ;;  %v229_v52 = vmax.bf16 %v213_v33, %v3610_v32  ;;  %v1829_v0 = vrot.slane %v1123_v28, %v3271_v17  ;;  %v3654_v28 = vld [vmem:[%s3264_s17 + $0x7c] sm:$0xf] }
  0x80   : > { %2544 = vrot.lane.b32.xlu0 %v3572_v47, %s3208_s22  ;;  %v1780_v8 = vrot.slane %v1773_v61, %v3271_v17  ;;  %v1794_v30 = vrot.slane %v1787_v48, %v3271_v17  ;;  %v1815_v59 = vrot.slane %v1122_v43, %v3271_v17  ;;  %v2433_v1 = vshll.u32 %v3617_v42, 16 }
  0x81   : > { %v1808_v5 = vrot.slane %v1801_v50, %v3271_v17  ;;  %v1843_v6 = vrot.slane %v1124_v40, %v3271_v17  ;;  %v1857_v45 = vrot.slane %v1125_v41, %v3271_v17  ;;  %v2431_v12 = vshrl.u32 %v3617_v42, 16 }
  0x82   : > { %v1822_v13 = vrot.slane %v1815_v59, %v3271_v17  ;;  %v1836_v14 = vrot.slane %v1829_v0, %v3271_v17  ;;  %v1871_v29 = vrot.slane %v1126_v49, %v3271_v17  ;;  %v2143_v19 = vunpack.c.l.b16 %v1780_v8 }
  0x83   : > { %2485 = vrot.lane.b32.xlu1 %v2476_v20, %s3204_s18  ;;  %v1850_v56 = vrot.slane %v1843_v6, %v3271_v17  ;;  %v1864_v37 = vrot.slane %v1857_v45, %v3271_v17  ;;  %v2144_v34 = vunpack.c.l.b16 %v1794_v30  ;;  %v2145_v22 = vunpack.c.l.b16 %v1808_v5 }
  0x84   : > { %2453 = vrot.lane.b32.xlu0 %v3582_v7, %s3205_s19  ;;  %v1878_v38 = vrot.slane %v1871_v29, %v3271_v17  ;;  %v2146_v24 = vunpack.c.l.b16 %v1822_v13  ;;  %v2147_v27 = vunpack.c.l.b16 %v1836_v14  ;;  %v3648_v15 = vrot.slane %v2433_v1, 1 }
  0x85   : > { %v2148_v23 = vunpack.c.l.b16 %v1850_v56  ;;  %v2149_v44 = vunpack.c.l.b16 %v1864_v37  ;;  %v2244_v20 = vrot.slane %v2144_v34, 7  ;;  %v2246_v54 = vrot.slane %v2145_v22, 6 }
  0x86   : > { %v2150_v53 = vunpack.c.l.b16 %v1878_v38  ;;  %v2248_v26 = vrot.slane %v2146_v24, 5  ;;  %v2250_v46 = vrot.slane %v2147_v27, 4  ;;  %v542_v39 = vcombine.high %v541_v51, %v541_v51 }
  0x87   : > { %2489 = vrot.lane.b32.xlu1 %v3572_v47, %s3204_s18  ;;  %v2245_v32 = vsel %vm2168_vm6, %v2244_v20, %v2143_v19  ;;  %v2252_v33 = vrot.slane %v2148_v23, 3  ;;  %v2254_v35 = vrot.slane %v2149_v44, 2  ;;  %v549_v43 = vrot.slane %v541_v51, %v3271_v17 }
  0x88   : > { %2523 = vrot.lane.b32.xlu0 %v3582_v7, %s3209_s23  ;;  %v2247_v40 = vsel %vm2171_vm7, %v2246_v54, %v2245_v32  ;;  %v2256_v41 = vrot.slane %v2150_v53, 1  ;;  %v565_v61 = vrot.slane %v228_v31, %v3271_v17  ;;  %v556_v49 = vrot.slane %v542_v39, %v3271_v17 }
  0x89   : > { %v2249_v48 = vsel %vm2174_vm8, %v2248_v26, %v2247_v40  ;;  %v230_v50 = vmax.bf16 %v3654_v28, %v3651_v25  ;;  %v3672_v8 = vrot.slane %v229_v52, %v3271_v17  ;;  %v557_v30 = vcombine.high %v549_v43, %v549_v43  ;;  %v3192_v25 = vld [vmem:[%s3993_s1 + $0x8] sm:$0xff]  }
  0x8a   : > { %v2251_v7 = vsel %vm2177_vm9, %v2250_v46, %v2249_v48  ;;  %v566_v59 = vcombine.high %v565_v61, %v565_v61  ;;  %v573_v51 = vrot.slane %v565_v61, %v3271_v17  ;;  %v558_v62 = vcombine.high %v556_v49, %v556_v49 }
  0x8b   : > { %2542 = vrot.lane.b32.xlu1 %v3548_v18, %s3208_s22  ;;  %v2253_v60 = vsel %vm2180_vm10, %v2252_v33, %v2251_v7  ;;  %v936_v31 = vshrl.u32 %v549_v43, 16  ;;  %v941_v0 = vshrl.u32 %v556_v49, 16  ;;  %v946_v6 = vshrl.u32 %v557_v30, 16 }
  0x8c   : > { %2527 = vrot.lane.b32.xlu0 %v3587_v58, %s3209_s23  ;;  %v2255_v52 = vsel %vm2183_vm11, %v2254_v35, %v2253_v60  ;;  %v580_v1 = vrot.slane %v566_v59, %v3271_v17  ;;  %v581_v5 = vcombine.high %v573_v51, %v573_v51  ;;  %v951_v13 = vshrl.u32 %v558_v62, 16 }
  0x8d   : > { %v2257_v45 = vsel %vm2186_vm12, %v2256_v41, %v2255_v52  ;;  %v956_v14 = vshrl.u32 %v573_v51, 16  ;;  %v1127_v29 = vmax.bf16 %v936_v31, %v549_v43  ;;  %v1128_v38 = vmax.bf16 %v941_v0, %v556_v49 }
  0x8e   : > { %v2291_v56 = vpack.c.b16 %v2257_v45, %v2257_v45  ;;  %v582_v37 = vcombine.high %v580_v1, %v580_v1  ;;  %v961_v19 = vshrl.u32 %v580_v1, 16  ;;  %v966_v34 = vshrl.u32 %v581_v5, 16 }
  0x8f   : > { %2546 = vrot.lane.b32.xlu1 %v3580_v55, %s3208_s22  ;;  %v1129_v22 = vmax.bf16 %v946_v6, %v557_v30  ;;  %v1130_v24 = vmax.bf16 %v951_v13, %v558_v62  ;;  %v1131_v27 = vmax.bf16 %v956_v14, %v573_v51  ;;  %v1885_v26 = vrot.slane %v1127_v29, %v3271_v17 }
  0x90   : > { %2572 = vrot.lane.b32.xlu0 %v3585_v57, %s3210_s24  ;;  %v2337_v23 = vshrl.u32 %v2291_v56, 16  ;;  %v2340_v44 = vshll.u32 %v2291_v56, 16  ;;  %v971_v20 = vshrl.u32 %v582_v37, 16  ;;  %v1132_v53 = vmax.bf16 %v961_v19, %v580_v1 }
  0x91   : > { %v1133_v54 = vmax.bf16 %v966_v34, %v581_v5  ;;  %v1899_v46 = vrot.slane %v1128_v38, %v3271_v17  ;;  %v1913_v32 = vrot.slane %v1129_v22, %v3271_v17  ;;  %v1927_v39 = vrot.slane %v1130_v24, %v3271_v17 }
  0x92   : > { %v2339_v33 = vrot.slane %v2337_v23, 7  ;;  %v1134_v35 = vmax.bf16 %v971_v20, %v582_v37  ;;  %v1941_v40 = vrot.slane %v1131_v27, %v3271_v17  ;;  %v1892_v41 = vrot.slane %v1885_v26, %v3271_v17  ;;  %v3191_v20 = vld [vmem:[%s3993_s1] sm:$0xff]  }
  0x93   : > { %2455 = vrot.lane.b32.xlu1 %v3585_v57, %s3205_s19  ;;  %v1906_v43 = vrot.slane %v1899_v46, %v3271_v17  ;;  %v1920_v61 = vrot.slane %v1913_v32, %v3271_v17  ;;  %v1955_v48 = vrot.slane %v1132_v53, %v3271_v17  ;;  %v1934_v7 = vrot.slane %v1927_v39, %v3271_v17 }
  0x94   : > { %2576 = vrot.lane.b32.xlu0 %v3596_v63, %s3210_s24  ;;  %v2342_v49 = vor.u32 %v2340_v44, %v2339_v33  ;;  %v1948_v30 = vrot.slane %v1941_v40, %v3271_v17  ;;  %v1969_v59 = vrot.slane %v1133_v54, %v3271_v17  ;;  %v1983_v60 = vrot.slane %v1134_v35, %v3271_v17 }
  0x95   : > { %v1962_v51 = vrot.slane %v1955_v48, %v3271_v17  ;;  %v2151_v62 = vunpack.c.l.b16 %v1892_v41  ;;  %v2152_v31 = vunpack.c.l.b16 %v1906_v43  ;;  %v2153_v1 = vunpack.c.l.b16 %v1920_v61  ;;  %3151 = vmatprep.subr.bf16.mxu0 %v3191_v20  ;;  %3165 = vmatprep.subr.bf16.mxu1 %v3191_v20 }
  0x96   : > { %v2375_v0 = vsel %vm3241_vm3, 0, %v2342_v49  ;;  %v1976_v52 = vrot.slane %v1969_v59, %v3271_v17  ;;  %v2154_v5 = vunpack.c.l.b16 %v1934_v7  ;;  %v1990_v45 = vrot.slane %v1983_v60, %v3271_v17  ;;  %3152 = vmatpush3.bf16.msra.mxu0 %v3191_v20  ;;  %3168 = vmatpush3.bf16.msra.mxu1 %v3191_v20 }
  0x97   : > { %2457 = vrot.lane.b32.xlu1 %v3587_v58, %s3205_s19  ;;  %v3713_v6 = vsel %vm3245_vm5, %v2375_v0, 0  ;;  %v2155_v13 = vunpack.c.l.b16 %v1948_v30  ;;  %v2156_v14 = vunpack.c.l.b16 %v1962_v51  ;;  %v2258_v19 = vrot.slane %v2152_v31, 7  ;;  %3153 = vmatprep.subr.bf16.mxu0 %v3192_v25 }
  0x98   : > { %2588 = vrot.lane.b32.xlu0 %v3548_v18, %s3211_s25  ;;  %v2438_v29 = vshrl.u32 %v3713_v6, 16  ;;  %v2440_v56 = vshll.u32 %v3713_v6, 16  ;;  %v2157_v37 = vunpack.c.l.b16 %v1976_v52  ;;  %v2158_v34 = vunpack.c.l.b16 %v1990_v45  ;;  %3166 = vmatprep.subr.bf16.mxu1 %v3192_v25 }
  0x99   : > { %v2260_v38 = vrot.slane %v2153_v1, 6  ;;  %v2262_v22 = vrot.slane %v2154_v5, 5  ;;  %v2264_v24 = vrot.slane %v2155_v13, 4  ;;  %v2259_v23 = vsel %vm2168_vm6, %v2258_v19, %v2151_v62 }
  0x9a   : > { %v2442_v27 = vrot.slane %v2440_v56, 1  ;;  %v2266_v44 = vrot.slane %v2156_v14, 3  ;;  %v3729_v18 = vor.u32 %v3648_v15, %v2431_v12  ;;  %v2268_v54 = vrot.slane %v2157_v37, 2  ;;  %3154 = vmatpush3.bf16.msra.mxu0 %v3192_v25  ;;  %3169 = vmatpush3.bf16.msra.mxu1 %v3192_v25 }
  0x9b   : > { %2525 = vrot.lane.b32.xlu1 %v3585_v57, %s3209_s23  ;;  %v2261_v53 = vsel %vm2171_vm7, %v2260_v38, %v2259_v23  ;;  %v590_v26 = vcombine.high %v3672_v8, %v3672_v8  ;;  %v2270_v32 = vrot.slane %v2158_v34, 1  ;;  %v597_v57 = vrot.slane %v3672_v8, %v3271_v17 }
  0x9c   : > { %2459 = vrot.lane.b32.xlu0 %v3596_v63, %s3205_s19  ;;  %v2263_v46 = vsel %vm2174_vm8, %v2262_v22, %v2261_v53  ;;  %v613_v12 = vrot.slane %v230_v50, %v3271_v17  ;;  %v3743_v15 = vor.u32 %v2442_v27, %v2438_v29  ;;  %v3747_v35 = vrot.slane %v3713_v6, 1 }
  0x9d   : > { %v2265_v33 = vsel %vm2177_vm9, %v2264_v24, %v2263_v46  ;;  %v604_v39 = vrot.slane %v590_v26, %v3271_v17  ;;  %v605_v41 = vcombine.high %v597_v57, %v597_v57  ;;  %v976_v61 = vshrl.u32 %v597_v57, 16 }
  0x9e   : > { %v2267_v40 = vsel %vm2180_vm10, %v2266_v44, %v2265_v33  ;;  %v614_v8 = vcombine.high %v613_v12, %v613_v12  ;;  %v621_v43 = vrot.slane %v613_v12, %v3271_v17 }
  0x9f   : > { %2529 = vrot.lane.b32.xlu1 %v3596_v63, %s3209_s23  ;;  %v2269_v28 = vsel %vm2183_vm11, %v2268_v54, %v2267_v40  ;;  %v606_v50 = vcombine.high %v604_v39, %v604_v39  ;;  %v981_v48 = vshrl.u32 %v604_v39, 16  ;;  %v986_v59 = vshrl.u32 %v605_v41, 16 }
  0xa0   : > { %2592 = vrot.lane.b32.xlu0 %v3580_v55, %s3211_s25  ;;  %v2271_v49 = vsel %vm2186_vm12, %v2270_v32, %v2269_v28  ;;  %v628_v7 = vrot.slane %v614_v8, %v3271_v17  ;;  %v629_v30 = vcombine.high %v621_v43, %v621_v43  ;;  %v996_v62 = vshrl.u32 %v621_v43, 16 }
  0xa1   : > { %v2292_v51 = vpack.c.b16 %v2271_v49, %v2271_v49  ;;  %v991_v60 = vshrl.u32 %v606_v50, 16  ;;  %v1135_v63 = vmax.bf16 %v976_v61, %v597_v57  ;;  %v1136_v1 = vmax.bf16 %v981_v48, %v604_v39 }
  0xa2   : > { %v630_v31 = vcombine.high %v628_v7, %v628_v7  ;;  %v1001_v0 = vshrl.u32 %v628_v7, 16  ;;  %v1006_v52 = vshrl.u32 %v629_v30, 16  ;;  %v1137_v13 = vmax.bf16 %v986_v59, %v605_v41 }
  0xa3   : > { %2574 = vrot.lane.b32.xlu1 %v3587_v58, %s3210_s24  ;;  %v2344_v5 = vshrl.u32 %v2292_v51, 16  ;;  %v2347_v45 = vshll.u32 %v2292_v51, 16  ;;  %v1138_v14 = vmax.bf16 %v991_v60, %v606_v50  ;;  %v1139_v56 = vmax.bf16 %v996_v62, %v621_v43 }
  0xa4   : > { %2463 = vrot.lane.b32.xlu0 %v3743_v15, %s3205_s19  ;;  %v1011_v29 = vshrl.u32 %v630_v31, 16  ;;  %v1140_v37 = vmax.bf16 %v1001_v0, %v628_v7  ;;  %v1141_v19 = vmax.bf16 %v1006_v52, %v629_v30  ;;  %v1997_v38 = vrot.slane %v1135_v63, %v3271_v17 }
  0xa5   : > { %v2346_v34 = vrot.slane %v2344_v5, 7  ;;  %v2011_v22 = vrot.slane %v1136_v1, %v3271_v17  ;;  %v2025_v24 = vrot.slane %v1137_v13, %v3271_v17  ;;  %v2039_v27 = vrot.slane %v1138_v14, %v3271_v17  ;;  %v3193_v1 = vld [vmem:[%s3993_s1 + $0x10] ss:$0 sps:$4 sm:$0x33]  }
  0xa6   : > { %v1142_v58 = vmax.bf16 %v1011_v29, %v630_v31  ;;  %v2053_v23 = vrot.slane %v1139_v56, %v3271_v17  ;;  %v2067_v44 = vrot.slane %v1140_v37, %v3271_v17  ;;  %v2004_v53 = vrot.slane %v1997_v38, %v3271_v17  ;;  %3171 = vmatprep.subr.msk.bf16.mxu0 %vm2788_vm13, %v3193_v1 }
  0xa7   : > { %2578 = vrot.lane.b32.xlu1 %v3729_v18, %s3210_s24  ;;  %v2349_v20 = vor.u32 %v2347_v45, %v2346_v34  ;;  %v2018_v54 = vrot.slane %v2011_v22, %v3271_v17  ;;  %v2032_v26 = vrot.slane %v2025_v24, %v3271_v17  ;;  %v2046_v46 = vrot.slane %v2039_v27, %v3271_v17 }
  0xa8   : > { %2491 = vrot.lane.b32.xlu0 %v3580_v55, %s3204_s18  ;;  %v2060_v32 = vrot.slane %v2053_v23, %v3271_v17  ;;  %v2074_v57 = vrot.slane %v2067_v44, %v3271_v17  ;;  %v2081_v12 = vrot.slane %v1141_v19, %v3271_v17  ;;  %v2095_v39 = vrot.slane %v1142_v58, %v3271_v17 }
  0xa9   : > { %v2376_v33 = vsel %vm3241_vm3, 0, %v2349_v20  ;;  %v2159_v40 = vunpack.c.l.b16 %v2004_v53  ;;  %v2160_v41 = vunpack.c.l.b16 %v2018_v54  ;;  %v2161_v43 = vunpack.c.l.b16 %v2032_v26  ;;  %3172 = vmatprep.subr.msk.bf16.mxu1 %vm2788_vm13, %v3193_v1  ;;  %v2452_v54 = vpop.permute.xlu0 %2451 }
  0xaa   : > { %v3788_v8 = vsel %vm3245_vm5, %v2376_v33, 0  ;;  %v2088_v55 = vrot.slane %v2081_v12, %v3271_v17  ;;  %v2162_v25 = vunpack.c.l.b16 %v2046_v46  ;;  %v2102_v50 = vrot.slane %v2095_v39, %v3271_v17 }
  0xab   : > { %2590 = vrot.lane.b32.xlu1 %v3572_v47, %s3211_s25  ;;  %v2447_v28 = vshll.u32 %v3788_v8, 16  ;;  %v2163_v61 = vunpack.c.l.b16 %v2060_v32  ;;  %v2164_v48 = vunpack.c.l.b16 %v2074_v57  ;;  %v2272_v7 = vrot.slane %v2160_v41, 7 }
  0xac   : > { %2495 = vrot.lane.b32.xlu0 %v3747_v35, %s3204_s18  ;;  %v2165_v49 = vunpack.c.l.b16 %v2088_v55  ;;  %v2166_v30 = vunpack.c.l.b16 %v2102_v50  ;;  %v2274_v59 = vrot.slane %v2161_v43, 6  ;;  %v2276_v51 = vrot.slane %v2162_v25, 5 }
  0xad   : > { %v2480_v60 = vrot.slane %v3617_v42, 1  ;;  %v2273_v62 = vsel %vm2168_vm6, %v2272_v7, %v2159_v40  ;;  %v2278_v63 = vrot.slane %v2163_v61, 4  ;;  %v2280_v47 = vrot.slane %v2164_v48, 3 }
  0xae   : > { %v2445_v17 = vshrl.u32 %v3788_v8, 16  ;;  %v2449_v31 = vrot.slane %v2447_v28, 1  ;;  %v2275_v0 = vsel %vm2171_vm7, %v2274_v59, %v2273_v62  ;;  %v2282_v52 = vrot.slane %v2165_v49, 2 }
  0xaf   : > { %2461 = vrot.lane.b32.xlu1 %v3729_v18, %s3205_s19  ;;  %v2277_v5 = vsel %vm2174_vm8, %v2276_v51, %v2275_v0  ;;  %v2284_v45 = vrot.slane %v2166_v30, 1  ;;  %v2790_v37 = vsel %vm2788_vm13, %v3193_v1, 0  ;;  %v2482_v58 = vrot.slane %v3788_v8, 1 }
  0xb0   : > { %2508 = vrot.lane.b32.xlu0 %v3617_v42, %s3206_s20  ;;  %v2279_v13 = vsel %vm2177_vm9, %v2278_v63, %v2277_v5  ;;  %v2450_v29 = vor.u32 %v2449_v31, %v2445_v17  ;;  %3156 = vmatpush3.bf16.msra.mxu0 %v2790_v37  ;;  %vm2723_vm6 = vcmask 261120   ;;  %vm2775_vm7 = vcmask 293888  }
  0xb1   : > { %v2281_v14 = vsel %vm2180_vm10, %v2280_v47, %v2279_v13  ;;  %3170 = vmatpush3.bf16.msra.mxu1 %v2790_v37  ;;  %vm2942_vm8 = vcmask 60416   ;;  %vm2951_vm9 = vcmask 58368  }
  0xb2   : > { %v2283_v56 = vsel %vm2183_vm11, %v2282_v52, %v2281_v14 }
  0xb3   : > { %2594 = vrot.lane.b32.xlu1 %v2480_v60, %s3211_s25  ;;  %v2285_v19 = vsel %vm2186_vm12, %v2284_v45, %v2283_v56 }
  0xb4   : > { %2512 = vrot.lane.b32.xlu0 %v3788_v8, %s3206_s20  ;;  %v2293_v34 = vpack.c.b16 %v2285_v19, %v2285_v19 }
  0xb6   : > { %v2351_v38 = vshrl.u32 %v2293_v34, 16  ;;  %v2354_v22 = vshll.u32 %v2293_v34, 16 }
  0xb7   : > { %2465 = vrot.lane.b32.xlu1 %v2450_v29, %s3205_s19 }
  0xb8   : > { %2531 = vrot.lane.b32.xlu0 %v3729_v18, %s3209_s23  ;;  %v2353_v24 = vrot.slane %v2351_v38, 7  ;;  %v2501_v46 = vpop.permute.xlu0 %2500 }
  0xba   : > { %v2356_v27 = vor.u32 %v2354_v22, %v2353_v24 }
  0xbb   : > { %2493 = vrot.lane.b32.xlu1 %v2480_v60, %s3204_s18 }
  0xbc   : > { %2535 = vrot.lane.b32.xlu0 %v2450_v29, %s3209_s23  ;;  %v2377_v23 = vsel %vm3241_vm3, 0, %v2356_v27  ;;  %vm2672_vm3 = vcmask 162816  }
  0xbd   : > { %v2389_v44 = vsel %vm3245_vm5, %v2377_v23, 0  ;;  %vm2706_vm5 = vcmask 228352  }
  0xbe   : > { %v2519_v18 = vshll.u32 %v2389_v44, 16  ;;  %v2517_v20 = vshrl.u32 %v2389_v44, 16  ;;  %v2539_v26 = vrot.slane %v2389_v44, 1 }
  0xbf   : > { %2497 = vrot.lane.b32.xlu1 %v2482_v58, %s3204_s18 }
  0xc0   : > { %2548 = vrot.lane.b32.xlu0 %v2480_v60, %s3208_s22  ;;  %v2521_v53 = vrot.slane %v2519_v18, 1 }
  0xc2   : > { %v2522_v2 = vor.u32 %v2521_v53, %v2517_v20 }
  0xc3   : > { %2510 = vrot.lane.b32.xlu1 %v3713_v6, %s3206_s20 }
  0xc4   : > { %2552 = vrot.lane.b32.xlu0 %v2482_v58, %s3208_s22 }
  0xc7   : > { %2514 = vrot.lane.b32.xlu1 %v2389_v44, %s3206_s20 }
  0xc8   : > { %2564 = vrot.lane.b32.xlu0 %v3713_v6, %s3207_s21 }
  0xcb   : > { %2533 = vrot.lane.b32.xlu1 %v3743_v15, %s3209_s23 }
  0xcc   : > { %2568 = vrot.lane.b32.xlu0 %v2389_v44, %s3207_s21 }
  0xcf   : > { %2537 = vrot.lane.b32.xlu1 %v2522_v2, %s3209_s23 }
  0xd0   : > { %2580 = vrot.lane.b32.xlu0 %v3743_v15, %s3210_s24  ;;  %v2503_v15 = vpop.permute.xlu1 %2502 }
  0xd3   : > { %2550 = vrot.lane.b32.xlu1 %v3747_v35, %s3208_s22 }
  0xd4   : > { %2584 = vrot.lane.b32.xlu0 %v2522_v2, %s3210_s24  ;;  %v2507_v12 = vpop.permute.xlu1 %2506 }
  0xd7   : > { %2554 = vrot.lane.b32.xlu1 %v2539_v26, %s3208_s22 }
  0xd8   : > { %2596 = vrot.lane.b32.xlu0 %v3747_v35, %s3211_s25 }
  0xdb   : > { %2566 = vrot.lane.b32.xlu1 %v3788_v8, %s3207_s21 }
  0xdc   : > { %2600 = vrot.lane.b32.xlu0 %v2539_v26, %s3211_s25 }
  0xde   : > { %v2505_v32 = vpop.permute.xlu0 %2504  ;;  %v2559_v39 = vpop.permute.xlu1 %2558 }
  0xdf   : > { %2570 = vrot.lane.b32.xlu1 %v3255_v9, %s3207_s21 }
  0xe2   : > { %v2557_v57 = vpop.permute.xlu0 %2556 }
  0xe3   : > { %2582 = vrot.lane.b32.xlu1 %v2450_v29, %s3210_s24 }
  0xe6   : > { %v3852_v33 = vpop.permute.xlu0 %2560 }
  0xe7   : > { %2586 = vrot.lane.b32.xlu1 %v3276_v21, %s3210_s24 }
  0xea   : > { %v2488_v35 = vpop.permute.xlu0 %2487 }
  0xeb   : > { %2598 = vrot.lane.b32.xlu1 %v2482_v58, %s3211_s25 }
  0xee   : > { %v2541_v40 = vpop.permute.xlu0 %2540 }
  0xef   : > { %2602 = vrot.lane.b32.xlu1 %v2475_v10, %s3211_s25  ;;  %v2606_v10 = vsel %vm2604_vm14, %v3255_v9, %v2452_v54 }
  0xf0   : > { %v2623_v17 = vsel %vm2621_vm15, %v2606_v10, %v2484_v4 }
  0xf1   : > { %v3860_v41 = vpop.permute.xlu1 %2562  ;;  %v2640_v52 = vsel %vm2638_vm1, %v2623_v17, %v2501_v46 }
  0xf2   : > { %v2545_v55 = vpop.permute.xlu0 %2544 }
  0xf5   : > { %v2486_v43 = vpop.permute.xlu1 %2485 }
  0xf6   : > { %v2454_v25 = vpop.permute.xlu0 %2453 }
  0xf7   : > { %v2608_v63 = vsel %vm2604_vm14, %v3442_v16, %v2454_v25 }
  0xf8   : > { %v2625_v31 = vsel %vm2621_vm15, %v2608_v63, %v2486_v43 }
  0xf9   : > { %v2490_v28 = vpop.permute.xlu1 %2489  ;;  %v2642_v5 = vsel %vm2638_vm1, %v2625_v31, %v2503_v15 }
  0xfa   : > { %v2524_v50 = vpop.permute.xlu0 %2523 }
  0xfb   : > { %v2657_v45 = vsel %vm2655_vm2, %v2640_v52, %v2524_v50 }
  0xfc   : > { %v2674_v56 = vsel %vm2672_vm3, %v2657_v45, %v2541_v40 }
  0xfd   : > { %v2543_v61 = vpop.permute.xlu1 %2542  ;;  %v2691_v22 = vsel %vm2689_vm4, %v2674_v56, %v2557_v57 }
  0xfe   : > { %v2528_v48 = vpop.permute.xlu0 %2527 }
 0x101   : > { %v2547_v49 = vpop.permute.xlu1 %2546 }
 0x102   : > { %v2573_v21 = vpop.permute.xlu0 %2572 }
 0x105   : > { %v2456_v7 = vpop.permute.xlu1 %2455 }
 0x106   : > { %v2577_v30 = vpop.permute.xlu0 %2576  ;;  %v2610_v1 = vsel %vm2604_vm14, %v3401_v11, %v2456_v7 }
 0x107   : > { %v2627_v29 = vsel %vm2621_vm15, %v2610_v1, %v2488_v35 }
 0x108   : > { %v2644_v38 = vsel %vm2638_vm1, %v2627_v29, %v2505_v32 }
 0x109   : > { %v2458_v59 = vpop.permute.xlu1 %2457  ;;  %v2661_v44 = vsel %vm2655_vm2, %v2644_v38, %v2528_v48 }
 0x10a   : > { %v2589_v51 = vpop.permute.xlu0 %2588  ;;  %v2612_v14 = vsel %vm2604_vm14, %v3540_v3, %v2458_v59  ;;  %v2708_v3 = vsel %vm2706_vm5, %v2691_v22, %v2573_v21  ;;  %v2678_v54 = vsel %vm2672_vm3, %v2661_v44, %v2545_v55 }
 0x10b   : > { %v2629_v19 = vsel %vm2621_vm15, %v2612_v14, %v2490_v28  ;;  %v2725_v20 = vsel %vm2723_vm6, %v2708_v3, %v2589_v51  ;;  %v2695_v15 = vsel %vm2689_vm4, %v2678_v54, %v3852_v33 }
 0x10c   : > { %v2646_v58 = vsel %vm2638_vm1, %v2629_v19, %v2507_v12  ;;  %v2712_v12 = vsel %vm2706_vm5, %v2695_v15, %v2577_v30 }
 0x10d   : > { %v2526_v60 = vpop.permute.xlu1 %2525 }
 0x10e   : > { %v3862_v62 = vpop.permute.xlu0 %2459  ;;  %v2659_v16 = vsel %vm2655_vm2, %v2642_v5, %v2526_v60 }
 0x10f   : > { %v2676_v37 = vsel %vm2672_vm3, %v2659_v16, %v2543_v61  ;;  %v2614_v1 = vsel %vm2604_vm14, %v3497_v36, %v3862_v62 }
 0x110   : > { %v2693_v24 = vsel %vm2689_vm4, %v2676_v37, %v2559_v39 }
 0x111   : > { %v2530_v47 = vpop.permute.xlu1 %2529 }
 0x112   : > { %v2593_v0 = vpop.permute.xlu0 %2592  ;;  %v2663_v18 = vsel %vm2655_vm2, %v2646_v58, %v2530_v47 }
 0x113   : > { %v2680_v26 = vsel %vm2672_vm3, %v2663_v18, %v2547_v49  ;;  %v2729_v40 = vsel %vm2723_vm6, %v2712_v12, %v2593_v0 }
 0x114   : > { %v2697_v57 = vsel %vm2689_vm4, %v2680_v26, %v3860_v41 }
 0x115   : > { %v2575_v9 = vpop.permute.xlu1 %2574 }
 0x116   : > { %v3876_v13 = vpop.permute.xlu0 %2463  ;;  %v2710_v27 = vsel %vm2706_vm5, %v2693_v24, %v2575_v9 }
 0x117   : > { %v2618_v16 = vsel %vm2604_vm14, %v3713_v6, %v3876_v13 }
 0x119   : > { %v2579_v11 = vpop.permute.xlu1 %2578 }
 0x11a   : > { %v2492_v34 = vpop.permute.xlu0 %2491  ;;  %v2714_v35 = vsel %vm2706_vm5, %v2697_v57, %v2579_v11 }
 0x11b   : > { %v2631_v9 = vsel %vm2621_vm15, %v2614_v1, %v2492_v34 }
 0x11d   : > { %v2591_v23 = vpop.permute.xlu1 %2590 }
 0x11e   : > { %v2727_v53 = vsel %vm2723_vm6, %v2710_v27, %v2591_v23  ;;  %v2496_v2 = vpop.permute.xlu0 %2495 }
 0x11f   : > { %v3113_v4 = vcombine.low %v2725_v20, %v2727_v53  ;;  %v2635_v34 = vsel %vm2621_vm15, %v2618_v16, %v2496_v2 }
 0x121   : > { %v2462_v46 = vpop.permute.xlu1 %2461  ;;  %3157 = vmatprep.mubr.msk.bf16.mxu0 %vm2775_vm7, %v3113_v4 }
 0x122   : > { %v2509_v32 = vpop.permute.xlu0 %2508  ;;  %v2616_v5 = vsel %vm2604_vm14, %v3617_v42, %v2462_v46 }
 0x123   : > { %v2648_v14 = vsel %vm2638_vm1, %v2631_v9, %v2509_v32 }
 0x125   : > { %v2595_v39 = vpop.permute.xlu1 %2594 }
 0x126   : > { %v2731_v55 = vsel %vm2723_vm6, %v2714_v35, %v2595_v39  ;;  %v2513_v43 = vpop.permute.xlu0 %2512 }
 0x127   : > { %v3114_v25 = vcombine.low %v2729_v40, %v2731_v55  ;;  %v2652_v22 = vsel %vm2638_vm1, %v2635_v34, %v2513_v43 }
 0x129   : > { %v2466_v28 = vpop.permute.xlu1 %2465  ;;  %3158 = vmatmul.mubr.msk.bf16.vlgmr.msra.gmra.mrb[0].mxu0 %vm2775_vm7, %v3114_v25 }
 0x12a   : > { %v2532_v50 = vpop.permute.xlu0 %2531  ;;  %v2620_v42 = vsel %vm2604_vm14, %v3788_v8, %v2466_v28 }
 0x12b   : > { %v2665_v11 = vsel %vm2655_vm2, %v2648_v14, %v2532_v50 }
 0x12d   : > { %v2494_v61 = vpop.permute.xlu1 %2493 }
 0x12e   : > { %v2536_v33 = vpop.permute.xlu0 %2535  ;;  %v2633_v45 = vsel %vm2621_vm15, %v2616_v5, %v2494_v61 }
 0x12f   : > { %v2669_v27 = vsel %vm2655_vm2, %v2652_v22, %v2536_v33 }
 0x131   : > { %v2498_v48 = vpop.permute.xlu1 %2497 }
 0x132   : > { %v2549_v41 = vpop.permute.xlu0 %2548  ;;  %v2637_v6 = vsel %vm2621_vm15, %v2620_v42, %v2498_v48 }
 0x133   : > { %v2682_v62 = vsel %vm2672_vm3, %v2665_v11, %v2549_v41 }
 0x135   : > { %v2511_v49 = vpop.permute.xlu1 %2510 }
 0x136   : > { %v2553_v7 = vpop.permute.xlu0 %2552  ;;  %v2650_v29 = vsel %vm2638_vm1, %v2633_v45, %v2511_v49 }
 0x137   : > { %v2686_v20 = vsel %vm2672_vm3, %v2669_v27, %v2553_v7 }
 0x139   : > { %v2515_v21 = vpop.permute.xlu1 %2514 }
 0x13a   : > { %v2565_v51 = vpop.permute.xlu0 %2564  ;;  %v2654_v24 = vsel %vm2638_vm1, %v2637_v6, %v2515_v21 }
 0x13b   : > { %v2699_v13 = vsel %vm2689_vm4, %v2682_v62, %v2565_v51 }
 0x13d   : > { %v2534_v30 = vpop.permute.xlu1 %2533 }
 0x13e   : > { %v2569_v10 = vpop.permute.xlu0 %2568  ;;  %v2667_v36 = vsel %vm2655_vm2, %v2650_v29, %v2534_v30 }
 0x13f   : > { %v2703_v54 = vsel %vm2689_vm4, %v2686_v20, %v2569_v10 }
 0x141   : > { %v2538_v59 = vpop.permute.xlu1 %2537 }
 0x142   : > { %v2581_v17 = vpop.permute.xlu0 %2580  ;;  %v2671_v23 = vsel %vm2655_vm2, %v2654_v24, %v2538_v59 }
 0x143   : > { %v2716_v3 = vsel %vm2706_vm5, %v2699_v13, %v2581_v17 }
 0x145   : > { %v2551_v60 = vpop.permute.xlu1 %2550 }
 0x146   : > { %v2585_v0 = vpop.permute.xlu0 %2584  ;;  %v2684_v19 = vsel %vm2672_vm3, %v2667_v36, %v2551_v60 }
 0x147   : > { %v2720_v46 = vsel %vm2706_vm5, %v2703_v54, %v2585_v0 }
 0x149   : > { %v2555_v63 = vpop.permute.xlu1 %2554 }
 0x14a   : > { %v2597_v56 = vpop.permute.xlu0 %2596  ;;  %v2688_v53 = vsel %vm2672_vm3, %v2671_v23, %v2555_v63 }
 0x14b   : > { %v2733_v44 = vsel %vm2723_vm6, %v2716_v3, %v2597_v56 }
 0x14d   : > { %v2567_v47 = vpop.permute.xlu1 %2566 }
 0x14e   : > { %v2701_v38 = vsel %vm2689_vm4, %v2684_v19, %v2567_v47  ;;  %v2601_v2 = vpop.permute.xlu0 %2600 }
 0x14f   : > { %v2737_v57 = vsel %vm2723_vm6, %v2720_v46, %v2601_v2 }
 0x151   : > { %v2571_v31 = vpop.permute.xlu1 %2570 }
 0x152   : > { %v2705_v26 = vsel %vm2689_vm4, %v2688_v53, %v2571_v31 }
 0x155   : > { %v2583_v52 = vpop.permute.xlu1 %2582 }
 0x156   : > { %v2718_v8 = vsel %vm2706_vm5, %v2701_v38, %v2583_v52 }
 0x159   : > { %v2587_v37 = vpop.permute.xlu1 %2586 }
 0x15a   : > { %v2722_v32 = vsel %vm2706_vm5, %v2705_v26, %v2587_v37 }
 0x15d   : > { %v2599_v58 = vpop.permute.xlu1 %2598 }
 0x15e   : > { %v2735_v18 = vsel %vm2723_vm6, %v2718_v8, %v2599_v58 }
 0x15f   : > { %v3115_v4 = vcombine.low %v2733_v44, %v2735_v18 }
 0x161   : > { %v2603_v15 = vpop.permute.xlu1 %2602  ;;  %3161 = vmatprep.mubr.msk.bf16.mxu1 %vm2775_vm7, %v3115_v4 }
 0x162   : > { %v2739_v12 = vsel %vm2723_vm6, %v2722_v32, %v2603_v15 }
 0x163   : > { %v3116_v35 = vcombine.low %v2737_v57, %v2739_v12 }
 0x165   : > { %3162 = vmatmul.mubr.msk.bf16.vlgmr.msra.gmra.mrb[0].mxu1 %vm2775_vm7, %v3116_v35 }
 0x1fc   : > { %v3159_v39 = vpop.f32.mrb[0].mxu0 }
 0x1fd   : > { %v3138_v40 = vpack.c.bf16 %v3159_v39, %v3159_v39  ;;  %v2826_v55 = vpop.f32.mrb[1].mxu0  ;;  %v2880_v50 = vmul.f32 %v3159_v39, %v3159_v39  ;;  %v2860_v30 = vsel %vm2621_vm15, %v3159_v39, 0.0 }
 0x1fe   : > { %v2878_v43 = vmul.f32 %v2826_v55, %v2826_v55  ;;  %v3136_v25 = vpack.c.bf16 %v2826_v55, %v2826_v55  ;;  %v3160_v28 = vpop.f32.mrb[2].mxu0  ;;  %v2857_v48 = vsel %vm2621_vm15, %v2826_v55, 0.0 }
 0x1ff   : > { %2945 = vst.msk [vmem:[%s3950_s8 + $0x8] sm:$0xf] %vm2942_vm8, %v3138_v40  ;;  %v3139_v61 = vpack.c.bf16 %v3160_v28, %v3160_v28  ;;  %v2829_v33 = vpop.f32.mrb[3].mxu0  ;;  %v2881_v51 = vmul.f32 %v3160_v28, %v3160_v28  ;;  %v2889_v47 = vsel %vm2621_vm15, %v2880_v50, 0.0  ;;  %v2862_v17 = vsel %vm2621_vm15, %v3160_v28, 0.0 }
 0x200   : > { %2943 = vst.msk [vmem:[%s3950_s8] sm:$0xf] %vm2942_vm8, %v3136_v25  ;;  %v2858_v49 = vsel %vm2621_vm15, %v2829_v33, 0.0  ;;  %v2879_v41 = vmul.f32 %v2829_v33, %v2829_v33  ;;  %v3137_v21 = vpack.c.bf16 %v2829_v33, %v2829_v33  ;;  %v2886_v59 = vsel %vm2621_vm15, %v2878_v43, 0.0 }
 0x201   : > { %2946 = vst.msk [vmem:[%s3950_s8 + $0xc] sm:$0xf] %vm2942_vm8, %v3139_v61  ;;  %v2859_v7 = vadd.f32 %v2858_v49, %v2857_v48  ;;  %v2891_v52 = vsel %vm2621_vm15, %v2881_v51, 0.0 }
 0x202   : > { %v2887_v60 = vsel %vm2621_vm15, %v2879_v41, 0.0  ;;  %2944 = vst.msk [vmem:[%s3950_s8 + $0x4] sm:$0xf] %vm2942_vm8, %v3137_v21 }
 0x203   : > { %v2861_v10 = vadd.f32 %v2860_v30, %v2859_v7  ;;  %v2888_v63 = vadd.f32 %v2887_v60, %v2886_v59 }
 0x205   : > { %v2890_v31 = vadd.f32 %v2889_v47, %v2888_v63  ;;  %v2863_v0 = vadd.f32 %v2862_v17, %v2861_v10 }
 0x207   : > { %v2892_v1 = vadd.f32 %v2891_v52, %v2890_v31 }
 0x238   : > { %v3163_v5 = vpop.f32.mrb[0].mxu1 }
 0x239   : > { %v3142_v9 = vpack.c.bf16 %v3163_v5, %v3163_v5  ;;  %v2842_v45 = vpop.f32.mrb[1].mxu1  ;;  %v2884_v37 = vmul.f32 %v3163_v5, %v3163_v5  ;;  %v2868_v22 = vsel %vm2621_vm15, %v3163_v5, 0.0 }
 0x23a   : > { %v2864_v16 = vsel %vm2621_vm15, %v2842_v45, 0.0  ;;  %v2882_v14 = vmul.f32 %v2842_v45, %v2842_v45  ;;  %v3140_v29 = vpack.c.bf16 %v2842_v45, %v2842_v45  ;;  %v3164_v56 = vpop.f32.mrb[2].mxu1 }
 0x23b   : > { %2949 = vst.msk [vmem:[%s3950_s8 + $0x18] sm:$0xf] %vm2942_vm8, %v3142_v9  ;;  %v2865_v11 = vadd.f32 %v2864_v16, %v2863_v0  ;;  %v2845_v36 = vpop.f32.mrb[3].mxu1  ;;  %v3143_v62 = vpack.c.bf16 %v3164_v56, %v3164_v56  ;;  %v2885_v24 = vmul.f32 %v3164_v56, %v3164_v56  ;;  %v2897_v27 = vsel %vm2621_vm15, %v2884_v37, 0.0 }
 0x23c   : > { %v2893_v42 = vsel %vm2621_vm15, %v2882_v14, 0.0  ;;  %2947 = vst.msk [vmem:[%s3950_s8 + $0x10] sm:$0xf] %vm2942_vm8, %v3140_v29  ;;  %v2866_v19 = vsel %vm2621_vm15, %v2845_v36, 0.0  ;;  %v2883_v34 = vmul.f32 %v2845_v36, %v2845_v36  ;;  %v3141_v38 = vpack.c.bf16 %v2845_v36, %v2845_v36 }
 0x23d   : > { %v2894_v6 = vadd.f32 %v2893_v42, %v2892_v1  ;;  %v2867_v13 = vadd.f32 %v2866_v19, %v2865_v11  ;;  %2950 = vst.msk [vmem:[%s3950_s8 + $0x1c] sm:$0xf] %vm2942_vm8, %v3143_v62  ;;  %v2870_v23 = vsel %vm2621_vm15, %v3164_v56, 0.0  ;;  %v2899_v20 = vsel %vm2621_vm15, %v2885_v24, 0.0 }
 0x23e   : > { %v2895_v3 = vsel %vm2621_vm15, %v2883_v34, 0.0  ;;  %2948 = vst.msk [vmem:[%s3950_s8 + $0x14] sm:$0xf] %vm2942_vm8, %v3141_v38 }
 0x23f   : > { %v2869_v8 = vadd.f32 %v2868_v22, %v2867_v13  ;;  %v2896_v58 = vadd.f32 %v2895_v3, %v2894_v6 }
 0x241   : > { %v2871_v44 = vadd.f32 %v2870_v23, %v2869_v8  ;;  %v2898_v18 = vadd.f32 %v2897_v27, %v2896_v58 }
 0x243   : > { %v2872_v53 = vrot.slane %v2871_v44, 4  ;;  %v2900_v2 = vadd.f32 %v2899_v20, %v2898_v18 }
 0x245   : > { %v2873_v4 = vadd.f32 %v2872_v53, %v2871_v44  ;;  %v2901_v54 = vrot.slane %v2900_v2, 4 }
 0x247   : > { %v2874_v26 = vrot.slane %v2873_v4, 2  ;;  %v2902_v46 = vadd.f32 %v2901_v54, %v2900_v2 }
 0x249   : > { %v2875_v32 = vadd.f32 %v2874_v26, %v2873_v4  ;;  %v2903_v15 = vrot.slane %v2902_v46, 2 }
 0x24b   : > { %v2876_v57 = vrot.slane %v2875_v32, 1  ;;  %v2904_v12 = vadd.f32 %v2903_v15, %v2902_v46 }
 0x24d   : > { %v2905_v35 = vrot.slane %v2904_v12, 1  ;;  %v2877_v39 = vadd.f32 %v2876_v57, %v2875_v32 }
 0x24f   : > { %v2906_v40 = vadd.f32 %v2905_v35, %v2904_v12 }
 0x251   : > { %v2908_v55 = vsel %vm2366_vm0, %v2877_v39, %v2906_v40 }
 0x252   : > { %2952 = vst.msk [vmem:[%s181_s14] sm:$0x3] %vm2951_vm9, %v2908_v55 }
 0x253 PF: > { %s14_s12 = sadd.s32 1, %s3200_s12  }
 0x254   : > { %p11_p4 = scmp.ge.s32.totalorder %s14_s12, 4  }
 0x256   :  { %13 = sbr.rel (!%p11_p4) target bundleno = 1 (0x1), region = 70 }

</bundles_post_ra>
